<compile_context>
chip_gen: v6e
topology: v6e:2x2x1
jax: 0.10.0
libtpu: 0.0.40
codegen_flags: <defaults>
</compile_context>

<pallas_src>
import functools

import jax
import jax.numpy as jnp
from jax import lax
from jax.experimental import pallas as pl
from jax.experimental.pallas import tpu as pltpu


def _round_up(x, m):
    return (x + m - 1) // m * m


@functools.lru_cache(maxsize=None)
def _vmem_limit_bytes():
    """Generation-aware VMEM budget: ~75% of physical (96 MiB v5e/v6e, 48 MiB v7x)."""
    cap = 128 * 1024 * 1024
    try:
        info = pltpu.get_tpu_info()
        cap = int(getattr(info, "vmem_capacity_bytes", cap))
    except Exception:
        pass
    return int(cap * 3 // 4)


@functools.lru_cache(maxsize=None)
def _roll_matches_jnp_roll() -> bool:
    """True if pltpu.roll follows jnp.roll semantics (elements move to higher indices).

    Probed once so the conv tap shifts stay correct across Mosaic versions; guarded
    with an interpret-mode fallback so AOT/CPU test environments cannot silently
    flip the convention.
    """
    def probe(x_ref, o_ref):
        o_ref[...] = pltpu.roll(x_ref[...], 1, axis=1)

    x = lax.broadcasted_iota(jnp.float32, (8, 128), 1)
    for interpret in (False, True):
        try:
            out = pl.pallas_call(
                probe, out_shape=jax.ShapeDtypeStruct((8, 128), jnp.float32),
                interpret=interpret)(x)
            return bool(out[0, 0] > 64.0)  # 127 -> jnp.roll convention, 1 -> opposite
        except Exception:
            continue
    return True  # current Mosaic behaviour


def _border_masks(H, W):
    """(8, H*W) 0/1 masks for the 8 non-centre 3x3 taps (dy-major, dx-minor order)."""
    yy, xx = jnp.meshgrid(jnp.arange(H), jnp.arange(W), indexing="ij")
    yy = yy.reshape(-1)
    xx = xx.reshape(-1)
    rows = []
    for dy in (-1, 0, 1):
        for dx in (-1, 0, 1):
            if dy == 0 and dx == 0:
                continue
            rows.append((yy + dy >= 0) & (yy + dy < H) & (xx + dx >= 0) & (xx + dx < W))
    return jnp.stack(rows, axis=0).astype(jnp.float32)


def _pick_batch_block(N, Cin_p, Cout_p, HW, in_bytes, out_bytes, vmem_limit):
    """Images per grid step: target ~2 MiB of I/O per step, cap double-buffered I/O
    at ~25% of the VMEM budget so im2col staging / accumulators still fit."""
    per_image_io = (Cin_p * in_bytes + Cout_p * out_bytes) * HW
    target = 2 * 1024 * 1024
    cap = max(1, (vmem_limit // 4) // (2 * per_image_io))
    return int(max(1, min(N, target // per_image_io, cap)))


def _double_conv_kernel(x_ref, w1_ref, w2_ref, gb_ref, mask_ref, o_ref, *,
                        H, W, bN, eps, compute_dtype, roll_like_jnp):
    """One grid step = bN images of DoubleConv.

    x_ref   : (bN, Cin_p,  H*W)      channels on sublanes, flattened spatial on lanes
    w1_ref  : (3, Cout_p, 3*Cin_p)   dy-grouped im2col-folded 3x3 weights (conv1)
    w2_ref  : (3, Cout_p, 3*Cout_p)  dy-grouped im2col-folded 3x3 weights (conv2)
    gb_ref  : (Cout_p, 4)            columns = g1, b1, g2, b2 (InstanceNorm affine)
    mask_ref: (8, H*W)               precomputed zero-padding masks, non-centre taps
    o_ref   : (bN, Cout_p, H*W)      lane-dense output block
    """
    HW = H * W
    inv_hw = 1.0 / float(HW)

    # Static 3x3 tap geometry, grouped by dy (3 accumulated matmuls per conv).
    tap_groups = []
    mrow = 0
    for dy in (-1, 0, 1):
        grp = []
        for dx in (-1, 0, 1):
            if dy == 0 and dx == 0:
                grp.append((0, None))                      # centre tap: no roll/mask
            else:
                delta = dy * W + dx
                shift = (-delta) % HW if roll_like_jnp else delta % HW
                grp.append((shift, mrow))
                mrow += 1
        tap_groups.append(grp)

    # Hoist resident constants out of the per-image loop (loaded once per grid step).
    mask_rows = [mask_ref[i:i + 1, :] for i in range(8)]    # 8 x (1, HW)
    g1 = gb_ref[:, 0:1]
    b1 = gb_ref[:, 1:2]
    g2 = gb_ref[:, 2:3]
    b2 = gb_ref[:, 3:4]

    def conv3x3(act, w_ref):
        # act: (C, HW).  Cast to the MXU operand dtype BEFORE rolls/masks so the
        # im2col staging runs at compute_dtype width (bf16 path halves it; on v5e,
        # which has no bf16 VPU, prefer compute_dtype=f32).  Weights arrive
        # pre-cast from the wrapper -- no per-step casts here.
        act_c = act.astype(compute_dtype)
        acc = None
        for gi in range(3):
            rows = []
            for shift, mi in tap_groups[gi]:
                r = act_c if shift == 0 else pltpu.roll(act_c, shift, axis=1)
                if mi is not None:
                    r = r * mask_rows[mi]                   # zero-pad across borders
                rows.append(r)
            patches = jnp.concatenate(rows, axis=0)         # (3*C, HW)
            d = jnp.dot(w_ref[gi], patches,
                        preferred_element_type=jnp.float32)  # (Cout_p, HW) f32
            acc = d if acc is None else acc + d
        return acc

    def inorm_relu(acc, g, b):
        # Single-pass E[x^2]-E[x]^2 statistics (clamped at 0 so it cannot NaN;
        # precision degrades only for very-large-mean activations -- fine in f32),
        # fused per-channel scale/shift (2 VPU ops on the big tensor), EUP rsqrt.
        ssum = jnp.sum(acc, axis=1, keepdims=True)          # (Cout_p, 1)
        ssq = jnp.sum(acc * acc, axis=1, keepdims=True)
        mean = ssum * inv_hw
        var = jnp.maximum(ssq * inv_hw - mean * mean, 0.0)
        scale = g * lax.rsqrt(var + eps)
        offs = b - mean * scale
        return jnp.maximum(acc * scale + offs, 0.0)

    def one_image(b, carry):
        h1 = inorm_relu(conv3x3(x_ref[b], w1_ref), g1, b1)
        h2 = inorm_relu(conv3x3(h1, w2_ref), g2, b2)
        o_ref[b] = h2.astype(o_ref.dtype)
        return carry

    # bN images per grid step amortize the per-step pipeline overhead.
    lax.fori_loop(0, bN, one_image, 0, unroll=bN <= 8)


def in_conv_pallas(x_nchw, w1, g1, b1, w2, g2, b2, *, eps=1e-5,
                   compute_dtype=jnp.float32, out_dtype=jnp.float32,
                   batch_block=None):
    """InConv / DoubleConv forward.

    x_nchw : (N, Cin, H, W) float32 (PyTorch NCHW).
    w1     : (3, 3, Cin,  Cout) conv1 weight (bias=False).
    w2     : (3, 3, Cout, Cout) conv2 weight (bias=False).
    g*, b* : (Cout,) InstanceNorm2d affine weight / bias.
    compute_dtype : jnp.float32 (exact) or jnp.bfloat16 (v6e/v7x MXU fast path;
        accumulation and InstanceNorm statistics stay in float32).
    out_dtype     : output dtype; bf16 halves output HBM writeback when the
        downstream layer accepts it.
    """
    N, Cin, H, W = x_nchw.shape
    Cout = w1.shape[-1]
    HW = H * W

    # Pad channel counts to a multiple of 8 so sublane concatenations stay
    # tile-aligned; padded channels get zero weights / zero affine params.
    Cin_p = _round_up(Cin, 8)
    Cout_p = _round_up(Cout, 8)

    vmem_limit = _vmem_limit_bytes()
    in_bytes = jnp.dtype(compute_dtype).itemsize
    out_bytes = jnp.dtype(out_dtype).itemsize
    bN = batch_block or _pick_batch_block(N, Cin_p, Cout_p, HW,
                                          in_bytes, out_bytes, vmem_limit)
    N_p = _round_up(N, bN)

    # TODO(synk): realistic UNet sizes (e.g. 512x512, Cout=64) cannot run as a single
    # fused sweep on v7x (64 MiB VMEM): InstanceNorm1 needs full-image stats of the
    # conv1 output before conv2 may read any strip.  That needs a strip-tiled
    # two-pass variant (pass A: conv1 + per-image sum/sumsq over H-strips with a
    # 1-row halo; pass B: normalize1 + conv2 + stats; finalize norm2).
    est_live = (2 * bN * (Cin_p * in_bytes + Cout_p * out_bytes) * HW   # dbl-buffered I/O
                + 3 * max(Cin_p, Cout_p) * HW * in_bytes                # one dy-group staging
                + 3 * Cout_p * HW * 4)                                  # acc + h1/h2 f32
    if est_live > vmem_limit:
        raise NotImplementedError(
            "image too large for the single-pass fused kernel; needs the strip-tiled "
            "two-pass variant (see TODO above)")

    # NCHW -> (N, C, H*W): free reshape (no transpose, no extra HBM round trip).
    # For the bf16 fast path the input is stored bf16 -> halved input DMA traffic.
    x_flat = x_nchw.reshape(N, Cin, HW).astype(compute_dtype)
    if (N_p - N) or (Cin_p - Cin):
        x_flat = jnp.pad(x_flat, ((0, N_p - N), (0, Cin_p - Cin), (0, 0)))

    def fold_weight(w, ci):
        # (3, 3, ci, Cout) -> (3, Cout_p, 3*ci_p): dy-grouped, dx-major / channel-minor
        # columns matching the in-kernel patch ordering; pre-cast to compute_dtype.
        ci_p = _round_up(ci, 8)
        w = jnp.pad(w.astype(jnp.float32),
                    ((0, 0), (0, 0), (0, ci_p - ci), (0, Cout_p - Cout)))
        w = jnp.transpose(w, (0, 3, 1, 2)).reshape(3, Cout_p, 3 * ci_p)
        return w.astype(compute_dtype)

    w1_mat = fold_weight(w1, Cin)
    w2_mat = fold_weight(w2, Cout)

    # InstanceNorm affine params merged into one resident (Cout_p, 4) block.
    def pad_out(p):
        return jnp.pad(p.astype(jnp.float32), (0, Cout_p - Cout))
    gb = jnp.stack([pad_out(g1), pad_out(b1), pad_out(g2), pad_out(b2)], axis=1)

    # Precomputed zero-padding border masks (8 non-centre taps), resident input.
    masks = _border_masks(H, W).astype(compute_dtype)

    kernel = functools.partial(
        _double_conv_kernel, H=H, W=W, bN=bN, eps=eps,
        compute_dtype=compute_dtype, roll_like_jnp=_roll_matches_jnp_roll())

    out_flat = pl.pallas_call(
        kernel,
        out_shape=jax.ShapeDtypeStruct((N_p, Cout_p, HW), out_dtype),
        grid_spec=pltpu.PrefetchScalarGridSpec(
            num_scalar_prefetch=0,
            grid=(N_p // bN,),
            in_specs=[
                pl.BlockSpec((bN, Cin_p, HW), lambda g: (g, 0, 0)),
                pl.BlockSpec((3, Cout_p, 3 * Cin_p), lambda g: (0, 0, 0)),
                pl.BlockSpec((3, Cout_p, 3 * Cout_p), lambda g: (0, 0, 0)),
                pl.BlockSpec((Cout_p, 4), lambda g: (0, 0)),
                pl.BlockSpec((8, HW), lambda g: (0, 0)),
            ],
            out_specs=pl.BlockSpec((bN, Cout_p, HW), lambda g: (g, 0, 0)),
        ),
        compiler_params=pltpu.CompilerParams(
            dimension_semantics=("parallel",),
            vmem_limit_bytes=vmem_limit,
        ),
    )(x_flat, w1_mat, w2_mat, gb, masks)

    out = out_flat[:N, :Cout, :]
    return out.reshape(N, Cout, H, W)


def in_conv_reference(x, w1, g1, b1, w2, g2, b2, eps=1e-5):
    """Pure-JAX reference matching the PyTorch module semantics (NCHW, f32)."""
    def conv(x, w):  # w: (3,3,Ci,Co) -> OIHW
        w_oihw = jnp.transpose(w, (3, 2, 0, 1))
        return lax.conv_general_dilated(
            x, w_oihw, window_strides=(1, 1), padding=((1, 1), (1, 1)),
            dimension_numbers=('NCHW', 'OIHW', 'NCHW'))

    def inorm(x, g, b):
        mean = jnp.mean(x, axis=(2, 3), keepdims=True)
        var = jnp.mean(jnp.square(x - mean), axis=(2, 3), keepdims=True)
        return ((x - mean) * lax.rsqrt(var + eps)
                * g.reshape(1, -1, 1, 1) + b.reshape(1, -1, 1, 1))

    h = jnp.maximum(inorm(conv(x, w1), g1, b1), 0.0)
    return jnp.maximum(inorm(conv(h, w2), g2, b2), 0.0)


if __name__ == "__main__":
    N, Cin, Cout, H, W = 2, 4, 8, 16, 16

    key = jax.random.PRNGKey(0)
    k_x, k_w1, k_w2, k_g1, k_b1, k_g2, k_b2 = jax.random.split(key, 7)

    x = jax.random.normal(k_x, (N, Cin, H, W), dtype=jnp.float32)
    # Conv weights stored as (kh, kw, Cin, Cout); no bias (matches bias=False).
    w1 = jax.random.normal(k_w1, (3, 3, Cin, Cout), dtype=jnp.float32) * 0.2
    w2 = jax.random.normal(k_w2, (3, 3, Cout, Cout), dtype=jnp.float32) * 0.2
    # InstanceNorm affine params (PyTorch inits gamma=1, beta=0; perturb for a stricter test).
    g1 = 1.0 + 0.1 * jax.random.normal(k_g1, (Cout,), dtype=jnp.float32)
    b1 = 0.1 * jax.random.normal(k_b1, (Cout,), dtype=jnp.float32)
    g2 = 1.0 + 0.1 * jax.random.normal(k_g2, (Cout,), dtype=jnp.float32)
    b2 = 0.1 * jax.random.normal(k_b2, (Cout,), dtype=jnp.float32)

    ref = jax.block_until_ready(in_conv_reference(x, w1, g1, b1, w2, g2, b2))

    # Exact (f32 MXU) path: must match the PyTorch/f32 reference tightly.
    out = jax.block_until_ready(in_conv_pallas(x, w1, g1, b1, w2, g2, b2))
    assert out.shape == (N, Cout, H, W), out.shape
    assert jnp.allclose(out, ref, rtol=1e-3, atol=1e-3), \
        f"f32 max abs err {jnp.max(jnp.abs(out - ref))}"

    # bf16 fast path (v6e/v7x): bf16 MXU operands + bf16 input/output HBM traffic,
    # f32 accumulation and f32 InstanceNorm statistics.  Generous tolerance.
    out_bf16 = jax.block_until_ready(
        in_conv_pallas(x, w1, g1, b1, w2, g2, b2,
                       compute_dtype=jnp.bfloat16, out_dtype=jnp.bfloat16))
    rel_err = (jnp.linalg.norm(out_bf16.astype(jnp.float32) - ref)
               / jnp.linalg.norm(ref))
    assert rel_err < 5e-2, f"bf16 relative error {rel_err}"

    print("KERNEL_OK")
</pallas_src>

<mosaic_0001>
module attributes {stable_mosaic.version = 11 : i64} {
  func.func @probe(%arg0: memref<8x128xf32, #tpu.memory_space<vmem>>, %arg1: memref<8x128xf32, #tpu.memory_space<vmem>>) attributes {dimension_semantics = [], scalar_prefetch = 0 : i64, scratch_operands = 0 : i64, tpu.core_type = #tpu.core_type<tc>} {
    %c0 = arith.constant 0 : index
    %c0_0 = arith.constant 0 : index
    %0 = vector.load %arg0[%c0, %c0_0] : memref<8x128xf32, #tpu.memory_space<vmem>>, vector<8x128xf32>
    %c1_i32 = arith.constant 1 : i32
    %1 = tpu.dynamic_rotate %0 by %c1_i32 dim 1 : vector<8x128xf32>, i32 -> vector<8x128xf32>
    %c0_1 = arith.constant 0 : index
    %c0_2 = arith.constant 0 : index
    %2 = vector.load %arg1[%c0_1, %c0_2] : memref<8x128xf32, #tpu.memory_space<vmem>>, vector<8x128xf32>
    tpu.vector_store %arg1[%c0_1, %c0_2], %1 {strides = array<i32>} : memref<8x128xf32, #tpu.memory_space<vmem>>, vector<8x128xf32>,
    return
  }
}

module attributes {stable_mosaic.version = 11 : i64} {
  func.func @_double_conv_kernel(%arg0: i32, %arg1: memref<2x8x256xf32, #tpu.memory_space<vmem>>, %arg2: memref<3x8x24xf32, #tpu.memory_space<vmem>>, %arg3: memref<3x8x24xf32, #tpu.memory_space<vmem>>, %arg4: memref<8x4xf32, #tpu.memory_space<vmem>>, %arg5: memref<8x256xf32, #tpu.memory_space<vmem>>, %arg6: memref<2x8x256xf32, #tpu.memory_space<vmem>>) attributes {dimension_semantics = [#tpu.dimension_semantics<parallel>], iteration_bounds = array<i64: 1>, scalar_prefetch = 0 : i64, scratch_operands = 0 : i64, tpu.core_type = #tpu.core_type<tc>, window_params = [{transform_indices = @transform_0, window_bounds = array<i64: 2, 8, 256>}, {pipeline_mode = #tpu.pipeline_mode<synchronous>, transform_indices = @transform_1, window_bounds = array<i64: 3, 8, 24>}, {pipeline_mode = #tpu.pipeline_mode<synchronous>, transform_indices = @transform_2, window_bounds = array<i64: 3, 8, 24>}, {pipeline_mode = #tpu.pipeline_mode<synchronous>, transform_indices = @transform_3, window_bounds = array<i64: 8, 4>}, {pipeline_mode = #tpu.pipeline_mode<synchronous>, transform_indices = @transform_4, window_bounds = array<i64: 8, 256>}, {transform_indices = @transform_5, window_bounds = array<i64: 2, 8, 256>}]} {
    %c0 = arith.constant 0 : index
    %c0_0 = arith.constant 0 : index
    %0 = vector.load %arg5[%c0, %c0_0] : memref<8x256xf32, #tpu.memory_space<vmem>>, vector<1x256xf32>
    %c1 = arith.constant 1 : index
    %c0_1 = arith.constant 0 : index
    %1 = vector.load %arg5[%c1, %c0_1] : memref<8x256xf32, #tpu.memory_space<vmem>>, vector<1x256xf32>
    %c2 = arith.constant 2 : index
    %c0_2 = arith.constant 0 : index
    %2 = vector.load %arg5[%c2, %c0_2] : memref<8x256xf32, #tpu.memory_space<vmem>>, vector<1x256xf32>
    %c3 = arith.constant 3 : index
    %c0_3 = arith.constant 0 : index
    %3 = vector.load %arg5[%c3, %c0_3] : memref<8x256xf32, #tpu.memory_space<vmem>>, vector<1x256xf32>
    %c4 = arith.constant 4 : index
    %c0_4 = arith.constant 0 : index
    %4 = vector.load %arg5[%c4, %c0_4] : memref<8x256xf32, #tpu.memory_space<vmem>>, vector<1x256xf32>
    %c5 = arith.constant 5 : index
    %c0_5 = arith.constant 0 : index
    %5 = vector.load %arg5[%c5, %c0_5] : memref<8x256xf32, #tpu.memory_space<vmem>>, vector<1x256xf32>
    %c6 = arith.constant 6 : index
    %c0_6 = arith.constant 0 : index
    %6 = vector.load %arg5[%c6, %c0_6] : memref<8x256xf32, #tpu.memory_space<vmem>>, vector<1x256xf32>
    %c7 = arith.constant 7 : index
    %c0_7 = arith.constant 0 : index
    %7 = vector.load %arg5[%c7, %c0_7] : memref<8x256xf32, #tpu.memory_space<vmem>>, vector<1x256xf32>
    %c0_8 = arith.constant 0 : index
    %c0_9 = arith.constant 0 : index
    %8 = vector.load %arg4[%c0_8, %c0_9] : memref<8x4xf32, #tpu.memory_space<vmem>>, vector<8x1xf32>
    %c0_10 = arith.constant 0 : index
    %c1_11 = arith.constant 1 : index
    %9 = vector.load %arg4[%c0_10, %c1_11] : memref<8x4xf32, #tpu.memory_space<vmem>>, vector<8x1xf32>
    %c0_12 = arith.constant 0 : index
    %c2_13 = arith.constant 2 : index
    %10 = vector.load %arg4[%c0_12, %c2_13] : memref<8x4xf32, #tpu.memory_space<vmem>>, vector<8x1xf32>
    %c0_14 = arith.constant 0 : index
    %c3_15 = arith.constant 3 : index
    %11 = vector.load %arg4[%c0_14, %c3_15] : memref<8x4xf32, #tpu.memory_space<vmem>>, vector<8x1xf32>
    %c0_i32 = arith.constant 0 : i32
    %12 = arith.index_cast %c0_i32 : i32 to index
    %c0_16 = arith.constant 0 : index
    %c0_17 = arith.constant 0 : index
    %13 = vector.load %arg1[%12, %c0_16, %c0_17] : memref<2x8x256xf32, #tpu.memory_space<vmem>>, vector<1x8x256xf32>
    %14 = vector.shape_cast %13 : vector<1x8x256xf32> to vector<8x256xf32>
    %c17_i32 = arith.constant 17 : i32
    %15 = tpu.dynamic_rotate %14 by %c17_i32 dim 1 : vector<8x256xf32>, i32 -> vector<8x256xf32>
    %16 = vector.broadcast %0 : vector<1x256xf32> to vector<8x256xf32>
    %17 = arith.mulf %15, %16 : vector<8x256xf32>
    %c16_i32 = arith.constant 16 : i32
    %18 = tpu.dynamic_rotate %14 by %c16_i32 dim 1 : vector<8x256xf32>, i32 -> vector<8x256xf32>
    %19 = vector.broadcast %1 : vector<1x256xf32> to vector<8x256xf32>
    %20 = arith.mulf %18, %19 : vector<8x256xf32>
    %c15_i32 = arith.constant 15 : i32
    %21 = tpu.dynamic_rotate %14 by %c15_i32 dim 1 : vector<8x256xf32>, i32 -> vector<8x256xf32>
    %22 = vector.broadcast %2 : vector<1x256xf32> to vector<8x256xf32>
    %23 = arith.mulf %21, %22 : vector<8x256xf32>
    %24 = tpu.concatenate %17, %20, %23 in 0 : vector<8x256xf32>, vector<8x256xf32>, vector<8x256xf32> -> vector<24x256xf32>
    %c0_18 = arith.constant 0 : index
    %c0_19 = arith.constant 0 : index
    %c0_20 = arith.constant 0 : index
    %25 = vector.load %arg2[%c0_18, %c0_19, %c0_20] : memref<3x8x24xf32, #tpu.memory_space<vmem>>, vector<1x8x24xf32>
    %26 = vector.shape_cast %25 : vector<1x8x24xf32> to vector<8x24xf32>
    %cst = arith.constant dense<0.000000e+00> : vector<8x256xf32>
    %27 = tpu.matmul %26, %24, %cst {dimension_numbers = #tpu.dot_dimension_numbers<[1], [0], [0], [1], [0, 0, 1, 1], [], []>} : vector<8x24xf32>, vector<24x256xf32>, vector<8x256xf32> -> vector<8x256xf32>
    %c1_i32 = arith.constant 1 : i32
    %28 = tpu.dynamic_rotate %14 by %c1_i32 dim 1 : vector<8x256xf32>, i32 -> vector<8x256xf32>
    %29 = vector.broadcast %3 : vector<1x256xf32> to vector<8x256xf32>
    %30 = arith.mulf %28, %29 : vector<8x256xf32>
    %c255_i32 = arith.constant 255 : i32
    %31 = tpu.dynamic_rotate %14 by %c255_i32 dim 1 : vector<8x256xf32>, i32 -> vector<8x256xf32>
    %32 = vector.broadcast %4 : vector<1x256xf32> to vector<8x256xf32>
    %33 = arith.mulf %31, %32 : vector<8x256xf32>
    %34 = tpu.concatenate %30, %14, %33 in 0 : vector<8x256xf32>, vector<8x256xf32>, vector<8x256xf32> -> vector<24x256xf32>
    %c1_21 = arith.constant 1 : index
    %c0_22 = arith.constant 0 : index
    %c0_23 = arith.constant 0 : index
    %35 = vector.load %arg2[%c1_21, %c0_22, %c0_23] : memref<3x8x24xf32, #tpu.memory_space<vmem>>, vector<1x8x24xf32>
    %36 = vector.shape_cast %35 : vector<1x8x24xf32> to vector<8x24xf32>
    %cst_24 = arith.constant dense<0.000000e+00> : vector<8x256xf32>
    %37 = tpu.matmul %36, %34, %cst_24 {dimension_numbers = #tpu.dot_dimension_numbers<[1], [0], [0], [1], [0, 0, 1, 1], [], []>} : vector<8x24xf32>, vector<24x256xf32>, vector<8x256xf32> -> vector<8x256xf32>
    %38 = arith.addf %27, %37 : vector<8x256xf32>
    %c241_i32 = arith.constant 241 : i32
    %39 = tpu.dynamic_rotate %14 by %c241_i32 dim 1 : vector<8x256xf32>, i32 -> vector<8x256xf32>
    %40 = vector.broadcast %5 : vector<1x256xf32> to vector<8x256xf32>
    %41 = arith.mulf %39, %40 : vector<8x256xf32>
    %c240_i32 = arith.constant 240 : i32
    %42 = tpu.dynamic_rotate %14 by %c240_i32 dim 1 : vector<8x256xf32>, i32 -> vector<8x256xf32>
    %43 = vector.broadcast %6 : vector<1x256xf32> to vector<8x256xf32>
    %44 = arith.mulf %42, %43 : vector<8x256xf32>
    %c239_i32 = arith.constant 239 : i32
    %45 = tpu.dynamic_rotate %14 by %c239_i32 dim 1 : vector<8x256xf32>, i32 -> vector<8x256xf32>
    %46 = vector.broadcast %7 : vector<1x256xf32> to vector<8x256xf32>
    %47 = arith.mulf %45, %46 : vector<8x256xf32>
    %48 = tpu.concatenate %41, %44, %47 in 0 : vector<8x256xf32>, vector<8x256xf32>, vector<8x256xf32> -> vector<24x256xf32>
    %c2_25 = arith.constant 2 : index
    %c0_26 = arith.constant 0 : index
    %c0_27 = arith.constant 0 : index
    %49 = vector.load %arg2[%c2_25, %c0_26, %c0_27] : memref<3x8x24xf32, #tpu.memory_space<vmem>>, vector<1x8x24xf32>
    %50 = vector.shape_cast %49 : vector<1x8x24xf32> to vector<8x24xf32>
    %cst_28 = arith.constant dense<0.000000e+00> : vector<8x256xf32>
    %51 = tpu.matmul %50, %48, %cst_28 {dimension_numbers = #tpu.dot_dimension_numbers<[1], [0], [0], [1], [0, 0, 1, 1], [], []>} : vector<8x24xf32>, vector<24x256xf32>, vector<8x256xf32> -> vector<8x256xf32>
    %52 = arith.addf %38, %51 : vector<8x256xf32>
    %cst_29 = arith.constant dense<0.000000e+00> : vector<8xf32>
    %53 = vector.multi_reduction <add>, %52, %cst_29 [1] : vector<8x256xf32> to vector<8xf32>
    %54 = vector.shape_cast %53 : vector<8xf32> to vector<8x1xf32>
    %55 = arith.mulf %52, %52 : vector<8x256xf32>
    %cst_30 = arith.constant dense<0.000000e+00> : vector<8xf32>
    %56 = vector.multi_reduction <add>, %55, %cst_30 [1] : vector<8x256xf32> to vector<8xf32>
    %57 = vector.shape_cast %56 : vector<8xf32> to vector<8x1xf32>
    %cst_31 = arith.constant 3.906250e-03 : f32
    %58 = vector.broadcast %cst_31 : f32 to vector<8x1xf32>
    %59 = arith.mulf %54, %58 : vector<8x1xf32>
    %cst_32 = arith.constant 3.906250e-03 : f32
    %60 = vector.broadcast %cst_32 : f32 to vector<8x1xf32>
    %61 = arith.mulf %57, %60 : vector<8x1xf32>
    %62 = arith.mulf %59, %59 : vector<8x1xf32>
    %63 = arith.subf %61, %62 : vector<8x1xf32>
    %cst_33 = arith.constant 0.000000e+00 : f32
    %64 = vector.broadcast %cst_33 : f32 to vector<8x1xf32>
    %65 = arith.maximumf %63, %64 : vector<8x1xf32>
    %cst_34 = arith.constant 9.99999974E-6 : f32
    %66 = vector.broadcast %cst_34 : f32 to vector<8x1xf32>
    %67 = arith.addf %65, %66 : vector<8x1xf32>
    %68 = math.rsqrt %67 : vector<8x1xf32>
    %69 = arith.mulf %8, %68 : vector<8x1xf32>
    %70 = arith.mulf %59, %69 : vector<8x1xf32>
    %71 = arith.subf %9, %70 : vector<8x1xf32>
    %72 = vector.broadcast %69 : vector<8x1xf32> to vector<8x256xf32>
    %73 = arith.mulf %52, %72 : vector<8x256xf32>
    %74 = vector.broadcast %71 : vector<8x1xf32> to vector<8x256xf32>
    %75 = arith.addf %73, %74 : vector<8x256xf32>
    %cst_35 = arith.constant 0.000000e+00 : f32
    %76 = vector.broadcast %cst_35 : f32 to vector<8x256xf32>
    %77 = arith.maximumf %75, %76 : vector<8x256xf32>
    %c17_i32_36 = arith.constant 17 : i32
    %78 = tpu.dynamic_rotate %77 by %c17_i32_36 dim 1 : vector<8x256xf32>, i32 -> vector<8x256xf32>
    %79 = vector.broadcast %0 : vector<1x256xf32> to vector<8x256xf32>
    %80 = arith.mulf %78, %79 : vector<8x256xf32>
    %c16_i32_37 = arith.constant 16 : i32
    %81 = tpu.dynamic_rotate %77 by %c16_i32_37 dim 1 : vector<8x256xf32>, i32 -> vector<8x256xf32>
    %82 = vector.broadcast %1 : vector<1x256xf32> to vector<8x256xf32>
    %83 = arith.mulf %81, %82 : vector<8x256xf32>
    %c15_i32_38 = arith.constant 15 : i32
    %84 = tpu.dynamic_rotate %77 by %c15_i32_38 dim 1 : vector<8x256xf32>, i32 -> vector<8x256xf32>
    %85 = vector.broadcast %2 : vector<1x256xf32> to vector<8x256xf32>
    %86 = arith.mulf %84, %85 : vector<8x256xf32>
    %87 = tpu.concatenate %80, %83, %86 in 0 : vector<8x256xf32>, vector<8x256xf32>, vector<8x256xf32> -> vector<24x256xf32>
    %c0_39 = arith.constant 0 : index
    %c0_40 = arith.constant 0 : index
    %c0_41 = arith.constant 0 : index
    %88 = vector.load %arg3[%c0_39, %c0_40, %c0_41] : memref<3x8x24xf32, #tpu.memory_space<vmem>>, vector<1x8x24xf32>
    %89 = vector.shape_cast %88 : vector<1x8x24xf32> to vector<8x24xf32>
    %cst_42 = arith.constant dense<0.000000e+00> : vector<8x256xf32>
    %90 = tpu.matmul %89, %87, %cst_42 {dimension_numbers = #tpu.dot_dimension_numbers<[1], [0], [0], [1], [0, 0, 1, 1], [], []>} : vector<8x24xf32>, vector<24x256xf32>, vector<8x256xf32> -> vector<8x256xf32>
    %c1_i32_43 = arith.constant 1 : i32
    %91 = tpu.dynamic_rotate %77 by %c1_i32_43 dim 1 : vector<8x256xf32>, i32 -> vector<8x256xf32>
    %92 = vector.broadcast %3 : vector<1x256xf32> to vector<8x256xf32>
    %93 = arith.mulf %91, %92 : vector<8x256xf32>
    %c255_i32_44 = arith.constant 255 : i32
    %94 = tpu.dynamic_rotate %77 by %c255_i32_44 dim 1 : vector<8x256xf32>, i32 -> vector<8x256xf32>
    %95 = vector.broadcast %4 : vector<1x256xf32> to vector<8x256xf32>
    %96 = arith.mulf %94, %95 : vector<8x256xf32>
    %97 = tpu.concatenate %93, %77, %96 in 0 : vector<8x256xf32>, vector<8x256xf32>, vector<8x256xf32> -> vector<24x256xf32>
    %c1_45 = arith.constant 1 : index
    %c0_46 = arith.constant 0 : index
    %c0_47 = arith.constant 0 : index
    %98 = vector.load %arg3[%c1_45, %c0_46, %c0_47] : memref<3x8x24xf32, #tpu.memory_space<vmem>>, vector<1x8x24xf32>
    %99 = vector.shape_cast %98 : vector<1x8x24xf32> to vector<8x24xf32>
    %cst_48 = arith.constant dense<0.000000e+00> : vector<8x256xf32>
    %100 = tpu.matmul %99, %97, %cst_48 {dimension_numbers = #tpu.dot_dimension_numbers<[1], [0], [0], [1], [0, 0, 1, 1], [], []>} : vector<8x24xf32>, vector<24x256xf32>, vector<8x256xf32> -> vector<8x256xf32>
    %101 = arith.addf %90, %100 : vector<8x256xf32>
    %c241_i32_49 = arith.constant 241 : i32
    %102 = tpu.dynamic_rotate %77 by %c241_i32_49 dim 1 : vector<8x256xf32>, i32 -> vector<8x256xf32>
    %103 = vector.broadcast %5 : vector<1x256xf32> to vector<8x256xf32>
    %104 = arith.mulf %102, %103 : vector<8x256xf32>
    %c240_i32_50 = arith.constant 240 : i32
    %105 = tpu.dynamic_rotate %77 by %c240_i32_50 dim 1 : vector<8x256xf32>, i32 -> vector<8x256xf32>
    %106 = vector.broadcast %6 : vector<1x256xf32> to vector<8x256xf32>
    %107 = arith.mulf %105, %106 : vector<8x256xf32>
    %c239_i32_51 = arith.constant 239 : i32
    %108 = tpu.dynamic_rotate %77 by %c239_i32_51 dim 1 : vector<8x256xf32>, i32 -> vector<8x256xf32>
    %109 = vector.broadcast %7 : vector<1x256xf32> to vector<8x256xf32>
    %110 = arith.mulf %108, %109 : vector<8x256xf32>
    %111 = tpu.concatenate %104, %107, %110 in 0 : vector<8x256xf32>, vector<8x256xf32>, vector<8x256xf32> -> vector<24x256xf32>
    %c2_52 = arith.constant 2 : index
    %c0_53 = arith.constant 0 : index
    %c0_54 = arith.constant 0 : index
    %112 = vector.load %arg3[%c2_52, %c0_53, %c0_54] : memref<3x8x24xf32, #tpu.memory_space<vmem>>, vector<1x8x24xf32>
    %113 = vector.shape_cast %112 : vector<1x8x24xf32> to vector<8x24xf32>
    %cst_55 = arith.constant dense<0.000000e+00> : vector<8x256xf32>
    %114 = tpu.matmul %113, %111, %cst_55 {dimension_numbers = #tpu.dot_dimension_numbers<[1], [0], [0], [1], [0, 0, 1, 1], [], []>} : vector<8x24xf32>, vector<24x256xf32>, vector<8x256xf32> -> vector<8x256xf32>
    %115 = arith.addf %101, %114 : vector<8x256xf32>
    %cst_56 = arith.constant dense<0.000000e+00> : vector<8xf32>
    %116 = vector.multi_reduction <add>, %115, %cst_56 [1] : vector<8x256xf32> to vector<8xf32>
    %117 = vector.shape_cast %116 : vector<8xf32> to vector<8x1xf32>
    %118 = arith.mulf %115, %115 : vector<8x256xf32>
    %cst_57 = arith.constant dense<0.000000e+00> : vector<8xf32>
    %119 = vector.multi_reduction <add>, %118, %cst_57 [1] : vector<8x256xf32> to vector<8xf32>
    %120 = vector.shape_cast %119 : vector<8xf32> to vector<8x1xf32>
    %cst_58 = arith.constant 3.906250e-03 : f32
    %121 = vector.broadcast %cst_58 : f32 to vector<8x1xf32>
    %122 = arith.mulf %117, %121 : vector<8x1xf32>
    %cst_59 = arith.constant 3.906250e-03 : f32
    %123 = vector.broadcast %cst_59 : f32 to vector<8x1xf32>
    %124 = arith.mulf %120, %123 : vector<8x1xf32>
    %125 = arith.mulf %122, %122 : vector<8x1xf32>
    %126 = arith.subf %124, %125 : vector<8x1xf32>
    %cst_60 = arith.constant 0.000000e+00 : f32
    %127 = vector.broadcast %cst_60 : f32 to vector<8x1xf32>
    %128 = arith.maximumf %126, %127 : vector<8x1xf32>
    %cst_61 = arith.constant 9.99999974E-6 : f32
    %129 = vector.broadcast %cst_61 : f32 to vector<8x1xf32>
    %130 = arith.addf %128, %129 : vector<8x1xf32>
    %131 = math.rsqrt %130 : vector<8x1xf32>
    %132 = arith.mulf %10, %131 : vector<8x1xf32>
    %133 = arith.mulf %122, %132 : vector<8x1xf32>
    %134 = arith.subf %11, %133 : vector<8x1xf32>
    %135 = vector.broadcast %132 : vector<8x1xf32> to vector<8x256xf32>
    %136 = arith.mulf %115, %135 : vector<8x256xf32>
    %137 = vector.broadcast %134 : vector<8x1xf32> to vector<8x256xf32>
    %138 = arith.addf %136, %137 : vector<8x256xf32>
    %cst_62 = arith.constant 0.000000e+00 : f32
    %139 = vector.broadcast %cst_62 : f32 to vector<8x256xf32>
    %140 = arith.maximumf %138, %139 : vector<8x256xf32>
    %141 = arith.index_cast %c0_i32 : i32 to index
    %c0_63 = arith.constant 0 : index
    %c0_64 = arith.constant 0 : index
    %142 = vector.load %arg6[%141, %c0_63, %c0_64] : memref<2x8x256xf32, #tpu.memory_space<vmem>>, vector<1x8x256xf32>
    %143 = vector.shape_cast %142 : vector<1x8x256xf32> to vector<8x256xf32>
    %144 = vector.shape_cast %140 : vector<8x256xf32> to vector<1x8x256xf32>
    tpu.vector_store %arg6[%141, %c0_63, %c0_64], %144 {strides = array<i32>} : memref<2x8x256xf32, #tpu.memory_space<vmem>>, vector<1x8x256xf32>,
    %c1_i32_65 = arith.constant 1 : i32
    %145 = arith.index_cast %c1_i32_65 : i32 to index
    %c0_66 = arith.constant 0 : index
    %c0_67 = arith.constant 0 : index
    %146 = vector.load %arg1[%145, %c0_66, %c0_67] : memref<2x8x256xf32, #tpu.memory_space<vmem>>, vector<1x8x256xf32>
    %147 = vector.shape_cast %146 : vector<1x8x256xf32> to vector<8x256xf32>
    %c17_i32_68 = arith.constant 17 : i32
    %148 = tpu.dynamic_rotate %147 by %c17_i32_68 dim 1 : vector<8x256xf32>, i32 -> vector<8x256xf32>
    %149 = vector.broadcast %0 : vector<1x256xf32> to vector<8x256xf32>
    %150 = arith.mulf %148, %149 : vector<8x256xf32>
    %c16_i32_69 = arith.constant 16 : i32
    %151 = tpu.dynamic_rotate %147 by %c16_i32_69 dim 1 : vector<8x256xf32>, i32 -> vector<8x256xf32>
    %152 = vector.broadcast %1 : vector<1x256xf32> to vector<8x256xf32>
    %153 = arith.mulf %151, %152 : vector<8x256xf32>
    %c15_i32_70 = arith.constant 15 : i32
    %154 = tpu.dynamic_rotate %147 by %c15_i32_70 dim 1 : vector<8x256xf32>, i32 -> vector<8x256xf32>
    %155 = vector.broadcast %2 : vector<1x256xf32> to vector<8x256xf32>
    %156 = arith.mulf %154, %155 : vector<8x256xf32>
    %157 = tpu.concatenate %150, %153, %156 in 0 : vector<8x256xf32>, vector<8x256xf32>, vector<8x256xf32> -> vector<24x256xf32>
    %c0_71 = arith.constant 0 : index
    %c0_72 = arith.constant 0 : index
    %c0_73 = arith.constant 0 : index
    %158 = vector.load %arg2[%c0_71, %c0_72, %c0_73] : memref<3x8x24xf32, #tpu.memory_space<vmem>>, vector<1x8x24xf32>
    %159 = vector.shape_cast %158 : vector<1x8x24xf32> to vector<8x24xf32>
    %cst_74 = arith.constant dense<0.000000e+00> : vector<8x256xf32>
    %160 = tpu.matmul %159, %157, %cst_74 {dimension_numbers = #tpu.dot_dimension_numbers<[1], [0], [0], [1], [0, 0, 1, 1], [], []>} : vector<8x24xf32>, vector<24x256xf32>, vector<8x256xf32> -> vector<8x256xf32>
    %c1_i32_75 = arith.constant 1 : i32
    %161 = tpu.dynamic_rotate %147 by %c1_i32_75 dim 1 : vector<8x256xf32>, i32 -> vector<8x256xf32>
    %162 = vector.broadcast %3 : vector<1x256xf32> to vector<8x256xf32>
    %163 = arith.mulf %161, %162 : vector<8x256xf32>
    %c255_i32_76 = arith.constant 255 : i32
    %164 = tpu.dynamic_rotate %147 by %c255_i32_76 dim 1 : vector<8x256xf32>, i32 -> vector<8x256xf32>
    %165 = vector.broadcast %4 : vector<1x256xf32> to vector<8x256xf32>
    %166 = arith.mulf %164, %165 : vector<8x256xf32>
    %167 = tpu.concatenate %163, %147, %166 in 0 : vector<8x256xf32>, vector<8x256xf32>, vector<8x256xf32> -> vector<24x256xf32>
    %c1_77 = arith.constant 1 : index
    %c0_78 = arith.constant 0 : index
    %c0_79 = arith.constant 0 : index
    %168 = vector.load %arg2[%c1_77, %c0_78, %c0_79] : memref<3x8x24xf32, #tpu.memory_space<vmem>>, vector<1x8x24xf32>
    %169 = vector.shape_cast %168 : vector<1x8x24xf32> to vector<8x24xf32>
    %cst_80 = arith.constant dense<0.000000e+00> : vector<8x256xf32>
    %170 = tpu.matmul %169, %167, %cst_80 {dimension_numbers = #tpu.dot_dimension_numbers<[1], [0], [0], [1], [0, 0, 1, 1], [], []>} : vector<8x24xf32>, vector<24x256xf32>, vector<8x256xf32> -> vector<8x256xf32>
    %171 = arith.addf %160, %170 : vector<8x256xf32>
    %c241_i32_81 = arith.constant 241 : i32
    %172 = tpu.dynamic_rotate %147 by %c241_i32_81 dim 1 : vector<8x256xf32>, i32 -> vector<8x256xf32>
    %173 = vector.broadcast %5 : vector<1x256xf32> to vector<8x256xf32>
    %174 = arith.mulf %172, %173 : vector<8x256xf32>
    %c240_i32_82 = arith.constant 240 : i32
    %175 = tpu.dynamic_rotate %147 by %c240_i32_82 dim 1 : vector<8x256xf32>, i32 -> vector<8x256xf32>
    %176 = vector.broadcast %6 : vector<1x256xf32> to vector<8x256xf32>
    %177 = arith.mulf %175, %176 : vector<8x256xf32>
    %c239_i32_83 = arith.constant 239 : i32
    %178 = tpu.dynamic_rotate %147 by %c239_i32_83 dim 1 : vector<8x256xf32>, i32 -> vector<8x256xf32>
    %179 = vector.broadcast %7 : vector<1x256xf32> to vector<8x256xf32>
    %180 = arith.mulf %178, %179 : vector<8x256xf32>
    %181 = tpu.concatenate %174, %177, %180 in 0 : vector<8x256xf32>, vector<8x256xf32>, vector<8x256xf32> -> vector<24x256xf32>
    %c2_84 = arith.constant 2 : index
    %c0_85 = arith.constant 0 : index
    %c0_86 = arith.constant 0 : index
    %182 = vector.load %arg2[%c2_84, %c0_85, %c0_86] : memref<3x8x24xf32, #tpu.memory_space<vmem>>, vector<1x8x24xf32>
    %183 = vector.shape_cast %182 : vector<1x8x24xf32> to vector<8x24xf32>
    %cst_87 = arith.constant dense<0.000000e+00> : vector<8x256xf32>
    %184 = tpu.matmul %183, %181, %cst_87 {dimension_numbers = #tpu.dot_dimension_numbers<[1], [0], [0], [1], [0, 0, 1, 1], [], []>} : vector<8x24xf32>, vector<24x256xf32>, vector<8x256xf32> -> vector<8x256xf32>
    %185 = arith.addf %171, %184 : vector<8x256xf32>
    %cst_88 = arith.constant dense<0.000000e+00> : vector<8xf32>
    %186 = vector.multi_reduction <add>, %185, %cst_88 [1] : vector<8x256xf32> to vector<8xf32>
    %187 = vector.shape_cast %186 : vector<8xf32> to vector<8x1xf32>
    %188 = arith.mulf %185, %185 : vector<8x256xf32>
    %cst_89 = arith.constant dense<0.000000e+00> : vector<8xf32>
    %189 = vector.multi_reduction <add>, %188, %cst_89 [1] : vector<8x256xf32> to vector<8xf32>
    %190 = vector.shape_cast %189 : vector<8xf32> to vector<8x1xf32>
    %cst_90 = arith.constant 3.906250e-03 : f32
    %191 = vector.broadcast %cst_90 : f32 to vector<8x1xf32>
    %192 = arith.mulf %187, %191 : vector<8x1xf32>
    %cst_91 = arith.constant 3.906250e-03 : f32
    %193 = vector.broadcast %cst_91 : f32 to vector<8x1xf32>
    %194 = arith.mulf %190, %193 : vector<8x1xf32>
    %195 = arith.mulf %192, %192 : vector<8x1xf32>
    %196 = arith.subf %194, %195 : vector<8x1xf32>
    %cst_92 = arith.constant 0.000000e+00 : f32
    %197 = vector.broadcast %cst_92 : f32 to vector<8x1xf32>
    %198 = arith.maximumf %196, %197 : vector<8x1xf32>
    %cst_93 = arith.constant 9.99999974E-6 : f32
    %199 = vector.broadcast %cst_93 : f32 to vector<8x1xf32>
    %200 = arith.addf %198, %199 : vector<8x1xf32>
    %201 = math.rsqrt %200 : vector<8x1xf32>
    %202 = arith.mulf %8, %201 : vector<8x1xf32>
    %203 = arith.mulf %192, %202 : vector<8x1xf32>
    %204 = arith.subf %9, %203 : vector<8x1xf32>
    %205 = vector.broadcast %202 : vector<8x1xf32> to vector<8x256xf32>
    %206 = arith.mulf %185, %205 : vector<8x256xf32>
    %207 = vector.broadcast %204 : vector<8x1xf32> to vector<8x256xf32>
    %208 = arith.addf %206, %207 : vector<8x256xf32>
    %cst_94 = arith.constant 0.000000e+00 : f32
    %209 = vector.broadcast %cst_94 : f32 to vector<8x256xf32>
    %210 = arith.maximumf %208, %209 : vector<8x256xf32>
    %c17_i32_95 = arith.constant 17 : i32
    %211 = tpu.dynamic_rotate %210 by %c17_i32_95 dim 1 : vector<8x256xf32>, i32 -> vector<8x256xf32>
    %212 = vector.broadcast %0 : vector<1x256xf32> to vector<8x256xf32>
    %213 = arith.mulf %211, %212 : vector<8x256xf32>
    %c16_i32_96 = arith.constant 16 : i32
    %214 = tpu.dynamic_rotate %210 by %c16_i32_96 dim 1 : vector<8x256xf32>, i32 -> vector<8x256xf32>
    %215 = vector.broadcast %1 : vector<1x256xf32> to vector<8x256xf32>
    %216 = arith.mulf %214, %215 : vector<8x256xf32>
    %c15_i32_97 = arith.constant 15 : i32
    %217 = tpu.dynamic_rotate %210 by %c15_i32_97 dim 1 : vector<8x256xf32>, i32 -> vector<8x256xf32>
    %218 = vector.broadcast %2 : vector<1x256xf32> to vector<8x256xf32>
    %219 = arith.mulf %217, %218 : vector<8x256xf32>
    %220 = tpu.concatenate %213, %216, %219 in 0 : vector<8x256xf32>, vector<8x256xf32>, vector<8x256xf32> -> vector<24x256xf32>
    %c0_98 = arith.constant 0 : index
    %c0_99 = arith.constant 0 : index
    %c0_100 = arith.constant 0 : index
    %221 = vector.load %arg3[%c0_98, %c0_99, %c0_100] : memref<3x8x24xf32, #tpu.memory_space<vmem>>, vector<1x8x24xf32>
    %222 = vector.shape_cast %221 : vector<1x8x24xf32> to vector<8x24xf32>
    %cst_101 = arith.constant dense<0.000000e+00> : vector<8x256xf32>
    %223 = tpu.matmul %222, %220, %cst_101 {dimension_numbers = #tpu.dot_dimension_numbers<[1], [0], [0], [1], [0, 0, 1, 1], [], []>} : vector<8x24xf32>, vector<24x256xf32>, vector<8x256xf32> -> vector<8x256xf32>
    %c1_i32_102 = arith.constant 1 : i32
    %224 = tpu.dynamic_rotate %210 by %c1_i32_102 dim 1 : vector<8x256xf32>, i32 -> vector<8x256xf32>
    %225 = vector.broadcast %3 : vector<1x256xf32> to vector<8x256xf32>
    %226 = arith.mulf %224, %225 : vector<8x256xf32>
    %c255_i32_103 = arith.constant 255 : i32
    %227 = tpu.dynamic_rotate %210 by %c255_i32_103 dim 1 : vector<8x256xf32>, i32 -> vector<8x256xf32>
    %228 = vector.broadcast %4 : vector<1x256xf32> to vector<8x256xf32>
    %229 = arith.mulf %227, %228 : vector<8x256xf32>
    %230 = tpu.concatenate %226, %210, %229 in 0 : vector<8x256xf32>, vector<8x256xf32>, vector<8x256xf32> -> vector<24x256xf32>
    %c1_104 = arith.constant 1 : index
    %c0_105 = arith.constant 0 : index
    %c0_106 = arith.constant 0 : index
    %231 = vector.load %arg3[%c1_104, %c0_105, %c0_106] : memref<3x8x24xf32, #tpu.memory_space<vmem>>, vector<1x8x24xf32>
    %232 = vector.shape_cast %231 : vector<1x8x24xf32> to vector<8x24xf32>
    %cst_107 = arith.constant dense<0.000000e+00> : vector<8x256xf32>
    %233 = tpu.matmul %232, %230, %cst_107 {dimension_numbers = #tpu.dot_dimension_numbers<[1], [0], [0], [1], [0, 0, 1, 1], [], []>} : vector<8x24xf32>, vector<24x256xf32>, vector<8x256xf32> -> vector<8x256xf32>
    %234 = arith.addf %223, %233 : vector<8x256xf32>
    %c241_i32_108 = arith.constant 241 : i32
    %235 = tpu.dynamic_rotate %210 by %c241_i32_108 dim 1 : vector<8x256xf32>, i32 -> vector<8x256xf32>
    %236 = vector.broadcast %5 : vector<1x256xf32> to vector<8x256xf32>
    %237 = arith.mulf %235, %236 : vector<8x256xf32>
    %c240_i32_109 = arith.constant 240 : i32
    %238 = tpu.dynamic_rotate %210 by %c240_i32_109 dim 1 : vector<8x256xf32>, i32 -> vector<8x256xf32>
    %239 = vector.broadcast %6 : vector<1x256xf32> to vector<8x256xf32>
    %240 = arith.mulf %238, %239 : vector<8x256xf32>
    %c239_i32_110 = arith.constant 239 : i32
    %241 = tpu.dynamic_rotate %210 by %c239_i32_110 dim 1 : vector<8x256xf32>, i32 -> vector<8x256xf32>
    %242 = vector.broadcast %7 : vector<1x256xf32> to vector<8x256xf32>
    %243 = arith.mulf %241, %242 : vector<8x256xf32>
    %244 = tpu.concatenate %237, %240, %243 in 0 : vector<8x256xf32>, vector<8x256xf32>, vector<8x256xf32> -> vector<24x256xf32>
    %c2_111 = arith.constant 2 : index
    %c0_112 = arith.constant 0 : index
    %c0_113 = arith.constant 0 : index
    %245 = vector.load %arg3[%c2_111, %c0_112, %c0_113] : memref<3x8x24xf32, #tpu.memory_space<vmem>>, vector<1x8x24xf32>
    %246 = vector.shape_cast %245 : vector<1x8x24xf32> to vector<8x24xf32>
    %cst_114 = arith.constant dense<0.000000e+00> : vector<8x256xf32>
    %247 = tpu.matmul %246, %244, %cst_114 {dimension_numbers = #tpu.dot_dimension_numbers<[1], [0], [0], [1], [0, 0, 1, 1], [], []>} : vector<8x24xf32>, vector<24x256xf32>, vector<8x256xf32> -> vector<8x256xf32>
    %248 = arith.addf %234, %247 : vector<8x256xf32>
    %cst_115 = arith.constant dense<0.000000e+00> : vector<8xf32>
    %249 = vector.multi_reduction <add>, %248, %cst_115 [1] : vector<8x256xf32> to vector<8xf32>
    %250 = vector.shape_cast %249 : vector<8xf32> to vector<8x1xf32>
    %251 = arith.mulf %248, %248 : vector<8x256xf32>
    %cst_116 = arith.constant dense<0.000000e+00> : vector<8xf32>
    %252 = vector.multi_reduction <add>, %251, %cst_116 [1] : vector<8x256xf32> to vector<8xf32>
    %253 = vector.shape_cast %252 : vector<8xf32> to vector<8x1xf32>
    %cst_117 = arith.constant 3.906250e-03 : f32
    %254 = vector.broadcast %cst_117 : f32 to vector<8x1xf32>
    %255 = arith.mulf %250, %254 : vector<8x1xf32>
    %cst_118 = arith.constant 3.906250e-03 : f32
    %256 = vector.broadcast %cst_118 : f32 to vector<8x1xf32>
    %257 = arith.mulf %253, %256 : vector<8x1xf32>
    %258 = arith.mulf %255, %255 : vector<8x1xf32>
    %259 = arith.subf %257, %258 : vector<8x1xf32>
    %cst_119 = arith.constant 0.000000e+00 : f32
    %260 = vector.broadcast %cst_119 : f32 to vector<8x1xf32>
    %261 = arith.maximumf %259, %260 : vector<8x1xf32>
    %cst_120 = arith.constant 9.99999974E-6 : f32
    %262 = vector.broadcast %cst_120 : f32 to vector<8x1xf32>
    %263 = arith.addf %261, %262 : vector<8x1xf32>
    %264 = math.rsqrt %263 : vector<8x1xf32>
    %265 = arith.mulf %10, %264 : vector<8x1xf32>
    %266 = arith.mulf %255, %265 : vector<8x1xf32>
    %267 = arith.subf %11, %266 : vector<8x1xf32>
    %268 = vector.broadcast %265 : vector<8x1xf32> to vector<8x256xf32>
    %269 = arith.mulf %248, %268 : vector<8x256xf32>
    %270 = vector.broadcast %267 : vector<8x1xf32> to vector<8x256xf32>
    %271 = arith.addf %269, %270 : vector<8x256xf32>
    %cst_121 = arith.constant 0.000000e+00 : f32
    %272 = vector.broadcast %cst_121 : f32 to vector<8x256xf32>
    %273 = arith.maximumf %271, %272 : vector<8x256xf32>
    %274 = arith.index_cast %c1_i32_65 : i32 to index
    %c0_122 = arith.constant 0 : index
    %c0_123 = arith.constant 0 : index
    %275 = vector.load %arg6[%274, %c0_122, %c0_123] : memref<2x8x256xf32, #tpu.memory_space<vmem>>, vector<1x8x256xf32>
    %276 = vector.shape_cast %275 : vector<1x8x256xf32> to vector<8x256xf32>
    %277 = vector.shape_cast %273 : vector<8x256xf32> to vector<1x8x256xf32>
    tpu.vector_store %arg6[%274, %c0_122, %c0_123], %277 {strides = array<i32>} : memref<2x8x256xf32, #tpu.memory_space<vmem>>, vector<1x8x256xf32>,
    %c2_i32 = arith.constant 2 : i32
    return
  }
  func.func @transform_0(%arg0: i32) -> (i32, i32, i32) {
    %c0_i32 = arith.constant 0 : i32
    %c0_i32_0 = arith.constant 0 : i32
    %c0_i32_1 = arith.constant 0 : i32
    return %arg0, %c0_i32, %c0_i32_0 : i32, i32, i32
  }
  func.func @transform_1(%arg0: i32) -> (i32, i32, i32) {
    %c0_i32 = arith.constant 0 : i32
    %c0_i32_0 = arith.constant 0 : i32
    %c0_i32_1 = arith.constant 0 : i32
    %c0_i32_2 = arith.constant 0 : i32
    return %c0_i32, %c0_i32_0, %c0_i32_1 : i32, i32, i32
  }
  func.func @transform_2(%arg0: i32) -> (i32, i32, i32) {
    %c0_i32 = arith.constant 0 : i32
    %c0_i32_0 = arith.constant 0 : i32
    %c0_i32_1 = arith.constant 0 : i32
    %c0_i32_2 = arith.constant 0 : i32
    return %c0_i32, %c0_i32_0, %c0_i32_1 : i32, i32, i32
  }
  func.func @transform_3(%arg0: i32) -> (i32, i32) {
    %c0_i32 = arith.constant 0 : i32
    %c0_i32_0 = arith.constant 0 : i32
    %c0_i32_1 = arith.constant 0 : i32
    return %c0_i32, %c0_i32_0 : i32, i32
  }
  func.func @transform_4(%arg0: i32) -> (i32, i32) {
    %c0_i32 = arith.constant 0 : i32
    %c0_i32_0 = arith.constant 0 : i32
    %c0_i32_1 = arith.constant 0 : i32
    return %c0_i32, %c0_i32_0 : i32, i32
  }
  func.func @transform_5(%arg0: i32) -> (i32, i32, i32) {
    %c0_i32 = arith.constant 0 : i32
    %c0_i32_0 = arith.constant 0 : i32
    %c0_i32_1 = arith.constant 0 : i32
    return %arg0, %c0_i32, %c0_i32_0 : i32, i32, i32
  }
}

</mosaic_0001>

<bundles_post_ra>
// kernel: tpu_custom_call.1
= control target key start
LH: loop header
LB: loop body
LE: loop exit
PB: predicated region body
PF: predicated region fallthrough
CT: control target
= control target key end

     0   :  { %6 = vsyncpa [#allocation3], 0  ;;  %s106_s0 = inlined_call_operand.hbm [shape: f32[8,128], index: 0, kind: input, shape index: {}]   ;;  %s107_s1 = inlined_call_operand.hbm [shape: f32[8,128], index: 1, kind: output, shape index: {}]  }
   0x1   :  { %7 = vsyncpa [#allocation4], 0  ;;  %s87_s6 = smov [#allocation2]  }
   0x2   :  { %s14_s7 = sshll.u32 %s87_s6, 4  ;;  %s15_s7 = int_to_ptr.vmem [resolvable:$true] %s14_s7 }
   0x3   :  { %s51_s8 = scalar_lea.vmem %s15_s7, 128  ;;  %p56_p1 = scmp.lt.s32.totalorder %s15_s7, %s15_s7 }
   0x4   :  { %p52_p0 = scmp.ne.s32.totalorder %s15_s7, %s51_s8  ;;  %p57_p2 = scmp.lt.s32.totalorder %s51_s8, %s51_s8 }
   0x6   :  { %p58_p3 = por %p57_p2, %p56_p1 }
   0x8   :  { %p59_p4 = pnand %p58_p3, %p52_p0 }
   0xa   :  { %62 = shalt.err (!%p59_p4)
}
   0xb   :  { %17 = dma.hbm_to_vmem [thread:$0]  %s106_s0, 128, %s15_s7, [#allocation3]  }
   0xc   :  { %83 = dma.done.wait [#allocation3], 128  }
   0xd   :  { %84 = vsyncadd [#allocation3], 4294967168  ;;  %v21_v0 = vld [vmem:[#allocation2] sm:$0xff]  ;;  %s88_s11 = smov 1   ;;  %s89_s12 = smov [#allocation5]  }
   0xe   :  { %22 = vrot.lane.b32.xlu0 %v21_v0, %s88_s11  ;;  %s31_s13 = sshll.u32 %s89_s12, 4  ;;  %s32_s13 = int_to_ptr.vmem [resolvable:$true] %s31_s13 }
   0xf   :  { %s63_s14 = scalar_lea.vmem %s32_s13, 128  ;;  %p68_p6 = scmp.lt.s32.totalorder %s32_s13, %s32_s13 }
  0x10   :  { %p64_p5 = scmp.ne.s32.totalorder %s32_s13, %s63_s14  ;;  %p69_p7 = scmp.lt.s32.totalorder %s63_s14, %s63_s14 }
  0x12   :  { %p70_p8 = por %p69_p7, %p68_p6 }
  0x14   :  { %p71_p9 = pnand %p70_p8, %p64_p5 }
  0x80   :  { %v23_v1 = vpop.permute.xlu0 %22 }
  0x81   :  { %24 = vst [vmem:[#allocation5] sm:$0xff] %v23_v1 }
  0x82   :  { %74 = shalt.err (!%p71_p9)
}
  0x83   :  { %34 = dma.vmem_to_hbm [thread:$0]  %s32_s13, 128, %s107_s1, [#allocation4]  }
  0x84   :  { %85 = dma.done.wait [#allocation4], 128  }
  0x85   :  { %86 = vsyncadd [#allocation4], 4294967168 }
  0x86   :  { %38 = vsyncpa [#allocation3], 1 }
  0x87   :  { %39 = vsyncpa [#allocation4], 1 }

// kernel: tpu_custom_call.1
= control target key start
LH: loop header
LB: loop body
LE: loop exit
PB: predicated region body
PF: predicated region fallthrough
CT: control target
= control target key end

     0   :  { %10 = vsyncpa [#allocation3], 0  ;;  %s2227_s0 = inlined_call_operand.hbm [shape: f32[2,8,256], index: 0, kind: input, shape index: {}]   ;;  %s2228_s1 = inlined_call_operand.hbm [shape: f32[3,8,24], index: 1, kind: input, shape index: {}]   ;;  %s2229_s2 = inlined_call_operand.hbm [shape: f32[3,8,24], index: 2, kind: input, shape index: {}]   ;;  %s2230_s3 = inlined_call_operand.vmem [shape: f32[8,4], index: 3, kind: input, shape index: {}]   ;;  %s2231_s4 = inlined_call_operand.vmem [shape: f32[8,256], index: 4, kind: input, shape index: {}]   ;;  %s2232_s5 = inlined_call_operand.hbm [shape: f32[2,8,256], index: 5, kind: output, shape index: {}]  }
   0x1   :  { %11 = vsyncpa [#allocation6], 0 }
   0x2   :  { %12 = vsyncpa [#allocation4], 0  ;;  %s1664_s18 = smov [#allocation5]  }
   0x3   :  { %s30_s19 = sshll.u32 %s1664_s18, 4  ;;  %s31_s19 = int_to_ptr.vmem [resolvable:$true] %s30_s19 }
   0x4   :  { %s1586_s20 = scalar_lea.vmem %s31_s19, 384  ;;  %p1591_p1 = scmp.lt.s32.totalorder %s31_s19, %s31_s19 }
   0x5   :  { %p1587_p0 = scmp.ne.s32.totalorder %s31_s19, %s1586_s20  ;;  %p1592_p2 = scmp.lt.s32.totalorder %s1586_s20, %s1586_s20 }
   0x7   :  { %p1593_p3 = por %p1592_p2, %p1591_p1 }
   0x9   :  { %p1594_p4 = pnand %p1593_p3, %p1587_p0 }
   0xb   :  { %1597 = shalt.err (!%p1594_p4)
}
   0xc   :  { %s1665_s21 = smov 128   ;;  %s1666_s22 = smov 8  }
   0xd   :  { %36 = dma.hbm_to_vmem [thread:$0]  %s2228_s1, 384, %s31_s19, [#allocation6], %s1665_s21, %s1665_s21, %s1666_s22  }
   0xe   :  { %s1667_s25 = smov [#allocation2]  }
   0xf   :  { %s18_s26 = sshll.u32 %s1667_s25, 4  ;;  %s19_s26 = int_to_ptr.vmem [resolvable:$true] %s18_s26 }
  0x10   :  { %s1606_s27 = scalar_lea.vmem %s19_s26, 512  ;;  %p1611_p6 = scmp.lt.s32.totalorder %s19_s26, %s19_s26 }
  0x11   :  { %p1607_p5 = scmp.ne.s32.totalorder %s19_s26, %s1606_s27  ;;  %p1612_p7 = scmp.lt.s32.totalorder %s1606_s27, %s1606_s27 }
  0x13   :  { %p1613_p8 = por %p1612_p7, %p1611_p6 }
  0x15   :  { %p1614_p9 = pnand %p1613_p8, %p1607_p5 }
  0x17   :  { %1617 = shalt.err (!%p1614_p9)
}
  0x18   :  { %s1668_s28 = smov 256   ;;  %s1669_s29 = smov 16  }
  0x19   :  { %24 = dma.hbm_to_vmem [thread:$0]  %s2227_s0, 512, %s19_s26, [#allocation3], %s1668_s28, %s1668_s28, %s1669_s29  }
  0x1a   :  { %s1670_s1 = smov [#allocation7]  }
  0x1b   :  { %s42_s7 = sshll.u32 %s1670_s1, 4  ;;  %s43_s7 = int_to_ptr.vmem [resolvable:$true] %s42_s7 }
  0x1c   :  { %s1626_s8 = scalar_lea.vmem %s43_s7, 384  ;;  %p1631_p11 = scmp.lt.s32.totalorder %s43_s7, %s43_s7 }
  0x1d   :  { %p1627_p10 = scmp.ne.s32.totalorder %s43_s7, %s1626_s8  ;;  %p1632_p12 = scmp.lt.s32.totalorder %s1626_s8, %s1626_s8 }
  0x1f   :  { %p1633_p13 = por %p1632_p12, %p1631_p11 }
  0x21   :  { %p1634_p0 = pnand %p1633_p13, %p1627_p10 }
  0x23   :  { %1637 = shalt.err (!%p1634_p0)
}
  0x24   :  { %48 = dma.hbm_to_vmem [thread:$0]  %s2229_s2, 384, %s43_s7, [#allocation6], %s1665_s21, %s1665_s21, %s1666_s22  }
  0x25   :  { %1658 = dma.done.wait [#allocation3], 512  }
  0x26   :  { %1659 = vsyncadd [#allocation3], 4294966784 }
  0x27   :  { %1660 = dma.done.wait [#allocation6], 768  }
  0x28   :  { %1661 = vsyncadd [#allocation6], 4294966528  ;;  %v1726_v0 = vld [vmem:[#allocation2] sm:$0xff]  ;;  %s1671_s0 = smov 15   ;;  %s1672_s11 = smov 127   ;;  %v1732_v1 = vld [vmem:[#allocation2 + $0x8] sm:$0xff]  ;;  %v84_v3 = vlaneseq }
  0x29   :  { %122 = vrot.lane.b32.xlu1 %v1726_v0, %s1671_s0  ;;  %163 = vrot.lane.b32.xlu0 %v1726_v0, %s1672_s11  ;;  %v1673_v2 = vmov 0.0   ;;  %s1674_s2 = smov 1   ;;  %s1675_s12 = smov 111   ;;  %v1528_v8 = vld [vmem:[%s2231_s4 + $0x4] ss:$8 sm:$0x3] }
  0x2a   :  { %253 = vmatprep.mubr.f32.mxu0 %v1673_v2  ;;  %327 = vmatprep.mubr.f32.mxu1 %v1673_v2  ;;  %s1676_s13 = smov 17   ;;  %s1677_s14 = smov 112   ;;  %v91_v4 = vshrl.u32 %v84_v3, 7  ;;  %v1764_v5 = vand.u32 127, %v84_v3  ;;  %v1833_v39 = vld [vmem:[#allocation5 + $0x8] sm:$0xff]  ;;  %vm185_vm4 = vcmask 195584  }
  0x2b   :  { %s1678_s15 = smov 113   ;;  %v1526_v9 = vld [vmem:[%s2231_s4 + $0x2] ss:$8 sm:$0x3] }
  0x2c   :  { %v1766_v6 = vsub.s32 0, %v91_v4  ;;  %v1768_v7 = vsub.s32 1, %v91_v4  ;;  %vm126_vm0 = vcmp.lt.s32.totalorder %v1764_v5, 15  ;;  %vm167_vm1 = vcmp.lt.s32.totalorder %v1764_v5, 127  ;;  %v1883_v3 = vld [vmem:[#allocation5] sm:$0xff] }
  0x2d   :  { %124 = vrot.lane.b32.xlu1 %v1732_v1, %s1671_s0  ;;  %165 = vrot.lane.b32.xlu0 %v1732_v1, %s1672_s11  ;;  %v1527_v12 = vld [vmem:[%s2231_s4 + $0x3] ss:$8 sm:$0x3]  ;;  %vm147_vm2 = vcmp.lt.s32.totalorder %v1764_v5, 1  ;;  %vm106_vm3 = vcmp.lt.s32.totalorder %v1764_v5, 16  ;;  %vm378_vm5 = vcmp.lt.s32.totalorder %v1764_v5, 111 }
  0x2e   :  { %v1782_v13 = vrot.slane %v1528_v8, %v1768_v7  ;;  %v1785_v14 = vrot.slane %v1526_v9, %v1768_v7  ;;  %v1788_v15 = vrot.slane %v1528_v8, %v1766_v6  ;;  %v1791_v16 = vrot.slane %v1526_v9, %v1766_v6  ;;  %v1525_v29 = vld [vmem:[%s2231_s4 + $0x1] ss:$8 sm:$0x3]  ;;  %v1531_v38 = vld [vmem:[%s2231_s4 + $0x7] ss:$8 sm:$0x3] }
  0x2f   :  { %v1795_v19 = vrot.slane %v1527_v12, %v1766_v6  ;;  %v1798_v20 = vrot.slane %v1527_v12, %v1768_v7  ;;  %v1824_v36 = vrot.slane %v1525_v29, %v1766_v6  ;;  %v1827_v37 = vrot.slane %v1525_v29, %v1768_v7  ;;  %v62_v48 = vld [vmem:[%s2231_s4] ss:$8 sm:$0x3]  ;;  %v1530_v57 = vld [vmem:[%s2231_s4 + $0x6] ss:$8 sm:$0x3] }
  0x30   :  { %v1843_v46 = vrot.slane %v1531_v38, %v1766_v6  ;;  %v1846_v47 = vrot.slane %v1531_v38, %v1768_v7  ;;  %vm86_vm6 = vcmp.lt.s32.totalorder %v1764_v5, 17  ;;  %v1862_v55 = vrot.slane %v62_v48, %v1766_v6  ;;  %v1529_v4 = vld [vmem:[%s2231_s4 + $0x5] ss:$8 sm:$0x3] }
  0x31   :  { %145 = vrot.lane.b32.xlu1 %v1732_v1, %s1674_s2  ;;  %143 = vrot.lane.b32.xlu0 %v1726_v0, %s1674_s2  ;;  %v1865_v56 = vrot.slane %v62_v48, %v1768_v7  ;;  %vm358_vm7 = vcmp.lt.s32.totalorder %v1764_v5, 112  ;;  %vm338_vm8 = vcmp.lt.s32.totalorder %v1764_v5, 113 }
  0x35   :  { %104 = vrot.lane.b32.xlu1 %v1732_v1, %s1669_s29  ;;  %102 = vrot.lane.b32.xlu0 %v1726_v0, %s1669_s29 }
  0x39   :  { %376 = vrot.lane.b32.xlu1 %v1732_v1, %s1675_s12  ;;  %374 = vrot.lane.b32.xlu0 %v1726_v0, %s1675_s12 }
  0x3d   :  { %82 = vrot.lane.b32.xlu1 %v1732_v1, %s1676_s13  ;;  %80 = vrot.lane.b32.xlu0 %v1726_v0, %s1676_s13 }
  0x41   :  { %356 = vrot.lane.b32.xlu1 %v1732_v1, %s1677_s14  ;;  %354 = vrot.lane.b32.xlu0 %v1726_v0, %s1677_s14 }
  0x45   :  { %336 = vrot.lane.b32.xlu1 %v1732_v1, %s1678_s15  ;;  %334 = vrot.lane.b32.xlu0 %v1726_v0, %s1678_s15 }
  0x9b   :  { %v123_v10 = vpop.permute.xlu1 %122  ;;  %v164_v11 = vpop.permute.xlu0 %163 }
  0x9f   :  { %v125_v17 = vpop.permute.xlu1 %124  ;;  %v166_v18 = vpop.permute.xlu0 %165 }
  0xa0   :  { %v128_v21 = vsel %vm126_vm0, %v125_v17, %v123_v10  ;;  %v168_v22 = vsel %vm167_vm1, %v164_v11, %v166_v18  ;;  %v169_v23 = vsel %vm167_vm1, %v166_v18, %v164_v11  ;;  %v127_v24 = vsel %vm126_vm0, %v123_v10, %v125_v17 }
  0xa1   :  { %v182_v25 = vmul.f32 %v1782_v13, %v169_v23  ;;  %v141_v26 = vmul.f32 %v1785_v14, %v127_v24  ;;  %v181_v27 = vmul.f32 %v1788_v15, %v168_v22  ;;  %v140_v28 = vmul.f32 %v1791_v16, %v128_v21 }
  0xa2   :  { %v1898_v18 = vrot.slane %v1529_v4, %v1766_v6  ;;  %v1901_v21 = vrot.slane %v1529_v4, %v1768_v7 }
  0xa3   :  { %v146_v30 = vpop.permute.xlu1 %145  ;;  %v144_v31 = vpop.permute.xlu0 %143  ;;  %215 = vmatprep.subr.mxu0 %v182_v25  ;;  %289 = vmatprep.subr.mxu1 %v141_v26 }
  0xa4   :  { %v148_v32 = vsel %vm147_vm2, %v144_v31, %v146_v30  ;;  %v149_v33 = vsel %vm147_vm2, %v146_v30, %v144_v31  ;;  %216 = vmatpush1.msra.mxu0 %v181_v27  ;;  %290 = vmatpush1.msra.mxu1 %v140_v28  ;;  %v1910_v27 = vld [vmem:[#allocation5 + $0x10] sm:$0xff] }
  0xa5   :  { %v161_v34 = vmul.f32 %v1795_v19, %v149_v33  ;;  %v162_v35 = vmul.f32 %v1798_v20, %v148_v32  ;;  %217 = vmatprep.subr.mxu0 %v1732_v1  ;;  %v1881_v1 = vrot.slane %v1530_v57, %v1768_v7 }
  0xa6   :  { %218 = vmatpush1.msra.mxu0 %v1726_v0  ;;  %v1878_v0 = vrot.slane %v1530_v57, %v1766_v6  ;;  %v1680_v57 = vmov 1  }
  0xa7   :  { %v105_v40 = vpop.permute.xlu1 %104  ;;  %v103_v41 = vpop.permute.xlu0 %102  ;;  %219 = vmatprep.subr.mxu0 %v162_v35  ;;  %1565 = vset.pattern.permute.xlu0 %v1680_v57 }
  0xa8   :  { %v107_v42 = vsel %vm106_vm3, %v103_v41, %v105_v40  ;;  %v108_v43 = vsel %vm106_vm3, %v105_v40, %v103_v41  ;;  %220 = vmatpush1.msra.mxu0 %v161_v34 }
  0xa9   :  { %v120_v44 = vmul.f32 %v1824_v36, %v108_v43  ;;  %v121_v45 = vmul.f32 %v1827_v37, %v107_v42  ;;  %1532 = vmatmul.mubr.msk.f32.vlgmr.msra.gmra.mxu0 %vm185_vm4, %v1833_v39 }
  0xaa   :  { %463 = vmatprep.mubr.f32.mxu0 %v1673_v2 }
  0xab   :  { %v377_v49 = vpop.permute.xlu1 %376  ;;  %v375_v50 = vpop.permute.xlu0 %374  ;;  %291 = vmatprep.subr.mxu1 %v121_v45 }
  0xac   :  { %v379_v51 = vsel %vm378_vm5, %v375_v50, %v377_v49  ;;  %v380_v52 = vsel %vm378_vm5, %v377_v49, %v375_v50  ;;  %292 = vmatpush1.msra.mxu1 %v120_v44  ;;  %v1679_v44 = vmov 0  }
  0xad   :  { %v392_v53 = vmul.f32 %v1843_v46, %v379_v51  ;;  %v393_v54 = vmul.f32 %v1846_v47, %v380_v52  ;;  %1564 = vset.pattern.permute.xlu1 %v1679_v44 }
  0xaf   :  { %v83_v58 = vpop.permute.xlu1 %82  ;;  %v81_v59 = vpop.permute.xlu0 %80  ;;  %425 = vmatprep.subr.mxu0 %v393_v54 }
  0xb0   :  { %v87_v60 = vsel %vm86_vm6, %v81_v59, %v83_v58  ;;  %v88_v61 = vsel %vm86_vm6, %v83_v58, %v81_v59  ;;  %426 = vmatpush1.msra.mxu0 %v392_v53  ;;  %v1918_v58 = vld [vmem:[%s2230_s3] sm:$0xff]  ;;  %s1683_s3 = smov [#allocation8]  }
  0xb1   :  { %v100_v62 = vmul.f32 %v1862_v55, %v88_v61  ;;  %v101_v63 = vmul.f32 %v1865_v56, %v87_v60  ;;  %s1512_s9 = sshll.u32 %s1683_s3, 4  ;;  %s1513_s9 = int_to_ptr.vmem [resolvable:$true] %s1512_s9 }
  0xb2   :  { %s1638_s10 = scalar_lea.vmem %s1513_s9, 512  ;;  %p1643_p2 = scmp.lt.s32.totalorder %s1513_s9, %s1513_s9 }
  0xb3   :  { %v357_v8 = vpop.permute.xlu1 %356  ;;  %v355_v9 = vpop.permute.xlu0 %354  ;;  %293 = vmatprep.subr.mxu1 %v101_v63  ;;  %p1639_p1 = scmp.ne.s32.totalorder %s1513_s9, %s1638_s10  ;;  %p1644_p3 = scmp.lt.s32.totalorder %s1638_s10, %s1638_s10 }
  0xb4   :  { %v359_v10 = vsel %vm358_vm7, %v355_v9, %v357_v8  ;;  %v360_v11 = vsel %vm358_vm7, %v357_v8, %v355_v9  ;;  %294 = vmatpush1.msra.mxu1 %v100_v62  ;;  %v1921_v62 = vld [vmem:[#allocation2 + $0x18] sm:$0xff]  ;;  %v1937_v8 = vld [vmem:[#allocation2 + $0x10] sm:$0xff] }
  0xb5   :  { %v372_v12 = vmul.f32 %v1878_v0, %v359_v10  ;;  %v373_v17 = vmul.f32 %v1881_v1, %v360_v11  ;;  %1533 = vmatmul.mubr.msk.f32.vlgmr.msra.gmra.mxu1 %vm185_vm4, %v1883_v3  ;;  %p1645_p4 = por %p1644_p3, %p1643_p2 }
  0xb6   :  { %620 = vmatprep.mubr.f32.mxu1 %v1673_v2 }
  0xb7   :  { %v337_v22 = vpop.permute.xlu1 %336  ;;  %v335_v23 = vpop.permute.xlu0 %334  ;;  %427 = vmatprep.subr.mxu0 %v373_v17  ;;  %p1646_p5 = pnand %p1645_p4, %p1639_p1 }
  0xb8   :  { %v339_v24 = vsel %vm338_vm8, %v335_v23, %v337_v22  ;;  %v340_v25 = vsel %vm338_vm8, %v337_v22, %v335_v23  ;;  %428 = vmatpush1.msra.mxu0 %v372_v12 }
  0xb9   :  { %v352_v26 = vmul.f32 %v1898_v18, %v339_v24  ;;  %v353_v6 = vmul.f32 %v1901_v21, %v340_v25 }
  0xbb   :  { %429 = vmatprep.subr.mxu0 %v353_v6 }
  0xbc   :  { %430 = vmatpush1.msra.mxu0 %v352_v26 }
  0xbd   :  { %1534 = vmatmul.mubr.msk.f32.vlgmr.msra.gmra.mxu0 %vm185_vm4, %v1910_v27 }
  0xbe   :  { %694 = vmatprep.mubr.f32.mxu0 %v1673_v2 }
 0x169   :  { %v255_v7 = vpop.f32.mrf.mxu0 }
 0x16b   :  { %v257_v29 = vpop.f32.mrf.mxu0 }
 0x175   :  { %v329_v28 = vpop.f32.mrf.mxu1 }
 0x176   :  { %v330_v31 = vadd.f32 %v329_v28, %v255_v7 }
 0x177   :  { %v331_v30 = vpop.f32.mrf.mxu1 }
 0x178   :  { %v332_v33 = vadd.f32 %v331_v30, %v257_v29 }
 0x17d   :  { %v465_v32 = vpop.f32.mrf.mxu0 }
 0x17e   :  { %v470_v34 = vadd.f32 %v465_v32, %v330_v31 }
 0x17f   :  { %v467_v35 = vpop.f32.mrf.mxu0 }
 0x180   :  { %v471_v38 = vadd.f32 %v467_v35, %v332_v33  ;;  %v475_v41 = vmul.f32 %v470_v34, %v470_v34 }
 0x182   :  { %v472_v40 = vadd.f32 %v471_v38, %v470_v34  ;;  %v476_v42 = vmul.f32 %v471_v38, %v471_v38 }
 0x184   :  { %473 = vadd.xlane.f32.xlu0 %v472_v40  ;;  %v477_v43 = vadd.f32 %v476_v42, %v475_v41 }
 0x186   :  { %478 = vadd.xlane.f32.xlu1 %v477_v43 }
 0x20d   :  { %v474_v45 = vpop.xlane.xlu0 %473 }
 0x20e   :  { %v480_v48 = vmul.f32 0.00390625, %v474_v45 }
 0x20f   :  { %v479_v49 = vpop.xlane.xlu1 %478 }
 0x210   :  { %v482_v50 = vmul.f32 %v480_v48, %v480_v48  ;;  %v481_v51 = vmul.f32 0.00390625, %v479_v49 }
 0x212   :  { %v483_v52 = vsub.f32 %v481_v51, %v482_v50 }
 0x214   :  { %v484_v53 = vmax.f32 %v483_v52, 0.0 }
 0x216   :  { %v485_v54 = vadd.f32 1e-05, %v484_v53 }
 0x218   :  { %1570 = vrsqrt.f32 %v485_v54 }
 0x225   :  { %v1571_v59 = vpop.eup %1570 }
 0x226   :  { %v487_v60 = vmul.f32 %v1571_v59, %v1918_v58 }
 0x228   :  { %496 = vperm.xlu1 %1564, %v487_v60   ;;  %v488_v61 = vmul.f32 %v487_v60, %v480_v48 }
 0x22a   :  { %490 = vrot.lane.b32.xlu0 %v488_v61, %s1674_s2 }
 0x22c   :  { %881 = vrot.lane.b32.xlu1 %v1921_v62, %s1672_s11 }
 0x230   :  { %864 = vrot.lane.b32.xlu1 %v1921_v62, %s1671_s0 }
 0x234   :  { %873 = vrot.lane.b32.xlu1 %v1921_v62, %s1674_s2 }
 0x238   :  { %856 = vrot.lane.b32.xlu1 %v1921_v62, %s1669_s29 }
 0x23c   :  { %1054 = vrot.lane.b32.xlu1 %v1921_v62, %s1675_s12 }
 0x240   :  { %848 = vrot.lane.b32.xlu1 %v1921_v62, %s1676_s13 }
 0x29c   :  { %v491_v63 = vpop.permute.xlu0 %490 }
 0x29d   :  { %v493_v4 = vsub.f32 %v1918_v58, %v491_v63 }
 0x29f   :  { %503 = vperm.xlu0 %1565, %v493_v4  }
 0x2a3   :  { %879 = vrot.lane.b32.xlu0 %v1937_v8, %s1672_s11  ;;  %v497_v9 = vpop.permute.xlu1 %496 }
 0x2a4   :  { %v499_v10 = vmul.f32 %v497_v9, %v470_v34  ;;  %v500_v12 = vmul.f32 %v497_v9, %v471_v38 }
 0x2a7   :  { %862 = vrot.lane.b32.xlu0 %v1937_v8, %s1671_s0  ;;  %v882_v25 = vpop.permute.xlu1 %881 }
 0x2ab   :  { %871 = vrot.lane.b32.xlu0 %v1937_v8, %s1674_s2  ;;  %v1975_v6 = vpop.permute.xlu1 %864 }
 0x2af   :  { %854 = vrot.lane.b32.xlu0 %v1937_v8, %s1669_s29  ;;  %v874_v28 = vpop.permute.xlu1 %873 }
 0x2b3   :  { %1052 = vrot.lane.b32.xlu0 %v1937_v8, %s1675_s12  ;;  %v1979_v30 = vpop.permute.xlu1 %856 }
 0x2b7   :  { %846 = vrot.lane.b32.xlu0 %v1937_v8, %s1676_s13  ;;  %v1983_v32 = vpop.permute.xlu1 %1054 }
 0x2bb   :  { %v1987_v34 = vpop.permute.xlu1 %848 }
 0x31a   :  { %v504_v11 = vpop.permute.xlu0 %503 }
 0x31b   :  { %v506_v17 = vadd.f32 %v504_v11, %v499_v10  ;;  %v507_v22 = vadd.f32 %v504_v11, %v500_v12 }
 0x31d   :  { %v508_v23 = vmax.f32 %v506_v17, 0.0  ;;  %v509_v24 = vmax.f32 %v507_v22, 0.0 }
 0x31e   :  { %v880_v26 = vpop.permute.xlu0 %879 }
 0x31f   :  { %526 = vrot.lane.b32.xlu0 %v508_v23, %s1671_s0  ;;  %543 = vrot.lane.b32.xlu1 %v508_v23, %s1672_s11 }
 0x322   :  { %v1977_v7 = vpop.permute.xlu0 %862 }
 0x323   :  { %518 = vrot.lane.b32.xlu0 %v508_v23, %s1669_s29  ;;  %545 = vrot.lane.b32.xlu1 %v509_v24, %s1672_s11 }
 0x326   :  { %v872_v29 = vpop.permute.xlu0 %871 }
 0x327   :  { %535 = vrot.lane.b32.xlu0 %v508_v23, %s1674_s2  ;;  %528 = vrot.lane.b32.xlu1 %v509_v24, %s1671_s0 }
 0x32a   :  { %v1981_v31 = vpop.permute.xlu0 %854 }
 0x32b   :  { %510 = vrot.lane.b32.xlu0 %v508_v23, %s1676_s13  ;;  %520 = vrot.lane.b32.xlu1 %v509_v24, %s1669_s29 }
 0x32e   :  { %v1985_v33 = vpop.permute.xlu0 %1052 }
 0x32f   :  { %717 = vrot.lane.b32.xlu0 %v508_v23, %s1675_s12  ;;  %537 = vrot.lane.b32.xlu1 %v509_v24, %s1674_s2 }
 0x332   :  { %v1989_v35 = vpop.permute.xlu0 %846 }
 0x333   :  { %709 = vrot.lane.b32.xlu0 %v508_v23, %s1677_s14  ;;  %512 = vrot.lane.b32.xlu1 %v509_v24, %s1676_s13 }
 0x337   :  { %701 = vrot.lane.b32.xlu0 %v508_v23, %s1678_s15  ;;  %719 = vrot.lane.b32.xlu1 %v509_v24, %s1675_s12 }
 0x33b   :  { %711 = vrot.lane.b32.xlu1 %v509_v24, %s1677_s14  ;;  %1044 = vrot.lane.b32.xlu0 %v1937_v8, %s1677_s14 }
 0x33f   :  { %703 = vrot.lane.b32.xlu1 %v509_v24, %s1678_s15  ;;  %1036 = vrot.lane.b32.xlu0 %v1937_v8, %s1678_s15 }
 0x343   :  { %1046 = vrot.lane.b32.xlu1 %v1921_v62, %s1677_s14 }
 0x347   :  { %1038 = vrot.lane.b32.xlu1 %v1921_v62, %s1678_s15 }
 0x391   :  { %v544_v38 = vpop.permute.xlu1 %543  ;;  %v527_v40 = vpop.permute.xlu0 %526 }
 0x395   :  { %v546_v41 = vpop.permute.xlu1 %545  ;;  %v519_v42 = vpop.permute.xlu0 %518 }
 0x396   :  { %v547_v43 = vsel %vm167_vm1, %v544_v38, %v546_v41  ;;  %v548_v44 = vsel %vm167_vm1, %v546_v41, %v544_v38  ;;  %v883_v38 = vsel %vm167_vm1, %v880_v26, %v882_v25 }
 0x397   :  { %v549_v45 = vmul.f32 %v547_v43, %v1788_v15  ;;  %v550_v48 = vmul.f32 %v548_v44, %v1782_v13 }
 0x399   :  { %582 = vmatprep.subr.mxu1 %v550_v48  ;;  %v529_v49 = vpop.permute.xlu1 %528  ;;  %v536_v50 = vpop.permute.xlu0 %535  ;;  %v2029_v48 = vld [vmem:[#allocation7] sm:$0xff] }
 0x39a   :  { %v530_v51 = vsel %vm126_vm0, %v527_v40, %v529_v49  ;;  %v531_v52 = vsel %vm126_vm0, %v529_v49, %v527_v40  ;;  %583 = vmatpush1.msra.mxu1 %v549_v45  ;;  %v884_v40 = vsel %vm167_vm1, %v882_v25, %v880_v26  ;;  %v885_v25 = vmul.f32 %v883_v38, %v1788_v15 }
 0x39b   :  { %v532_v53 = vmul.f32 %v531_v52, %v1791_v16  ;;  %v533_v54 = vmul.f32 %v530_v51, %v1785_v14  ;;  %584 = vmatprep.subr.mxu1 %v509_v24  ;;  %v886_v26 = vmul.f32 %v884_v40, %v1782_v13  ;;  %v876_v51 = vsel %vm147_vm2, %v874_v28, %v872_v29 }
 0x39c   :  { %585 = vmatpush1.msra.mxu1 %v508_v23  ;;  %v2015_v23 = vld [vmem:[#allocation7 + $0x8] sm:$0xff]  ;;  %v858_v38 = vsel %vm106_vm3, %v1981_v31, %v1979_v30 }
 0x39d   :  { %v521_v57 = vpop.permute.xlu1 %520  ;;  %656 = vmatprep.subr.mxu0 %v533_v54  ;;  %v511_v59 = vpop.permute.xlu0 %510 }
 0x39e   :  { %v522_v60 = vsel %vm106_vm3, %v519_v42, %v521_v57  ;;  %v523_v61 = vsel %vm106_vm3, %v521_v57, %v519_v42  ;;  %657 = vmatpush1.msra.mxu0 %v532_v53 }
 0x39f   :  { %v524_v63 = vmul.f32 %v523_v61, %v1824_v36  ;;  %v525_v4 = vmul.f32 %v522_v60, %v1827_v37 }
 0x3a1   :  { %v538_v9 = vpop.permute.xlu1 %537  ;;  %658 = vmatprep.subr.mxu0 %v525_v4  ;;  %v718_v10 = vpop.permute.xlu0 %717 }
 0x3a2   :  { %v539_v11 = vsel %vm147_vm2, %v536_v50, %v538_v9  ;;  %v540_v12 = vsel %vm147_vm2, %v538_v9, %v536_v50  ;;  %659 = vmatpush1.msra.mxu0 %v524_v63  ;;  %v875_v50 = vsel %vm147_vm2, %v872_v29, %v874_v28  ;;  %v1057_v28 = vsel %vm378_vm5, %v1983_v32, %v1985_v33 }
 0x3a3   :  { %v541_v17 = vmul.f32 %v540_v12, %v1795_v19  ;;  %v542_v22 = vmul.f32 %v539_v11, %v1798_v20  ;;  %v877_v29 = vmul.f32 %v876_v51, %v1795_v19  ;;  %v1056_v63 = vsel %vm378_vm5, %v1985_v33, %v1983_v32 }
 0x3a4   :  { %v866_v32 = vsel %vm126_vm0, %v1977_v7, %v1975_v6  ;;  %v1058_v33 = vmul.f32 %v1056_v63, %v1843_v46 }
 0x3a5   :  { %v513_v24 = vpop.permute.xlu1 %512  ;;  %586 = vmatprep.subr.mxu1 %v542_v22  ;;  %v710_v45 = vpop.permute.xlu0 %709 }
 0x3a6   :  { %v514_v41 = vsel %vm86_vm6, %v511_v59, %v513_v24  ;;  %v515_v42 = vsel %vm86_vm6, %v513_v24, %v511_v59  ;;  %587 = vmatpush1.msra.mxu1 %v541_v17  ;;  %v878_v59 = vmul.f32 %v875_v50, %v1798_v20 }
 0x3a7   :  { %v516_v43 = vmul.f32 %v515_v42, %v1862_v55  ;;  %v517_v44 = vmul.f32 %v514_v41, %v1865_v56  ;;  %1535 = vmatmul.mubr.msk.f32.vlgmr.msra.gmra.mxu1 %vm185_vm4, %v2015_v23  ;;  %v869_v42 = vmul.f32 %v866_v32, %v1785_v14 }
 0x3a8   :  { %794 = vmatprep.mubr.f32.mxu1 %v1673_v2 }
 0x3a9   :  { %v720_v49 = vpop.permute.xlu1 %719  ;;  %660 = vmatprep.subr.mxu0 %v517_v44  ;;  %v702_v60 = vpop.permute.xlu0 %701  ;;  %v861_v44 = vmul.f32 %v858_v38, %v1827_v37 }
 0x3aa   :  { %v721_v52 = vsel %vm378_vm5, %v718_v10, %v720_v49  ;;  %v722_v53 = vsel %vm378_vm5, %v720_v49, %v718_v10  ;;  %661 = vmatpush1.msra.mxu0 %v516_v43  ;;  %v1059_v10 = vmul.f32 %v1057_v28, %v1846_v47 }
 0x3ab   :  { %v723_v54 = vmul.f32 %v721_v52, %v1843_v46  ;;  %v724_v57 = vmul.f32 %v722_v53, %v1846_v47  ;;  %917 = vmatprep.subr.mxu0 %v886_v26  ;;  %1536 = vmatmul.mubr.msk.f32.vlgmr.msra.gmra.mxu0 %vm185_vm4, %v2029_v48 }
 0x3ac   :  { %918 = vmatpush1.msra.mxu0 %v885_v25  ;;  %955 = vmatprep.mubr.f32.mxu0 %v1673_v2 }
 0x3ad   :  { %v712_v61 = vpop.permute.xlu1 %711  ;;  %756 = vmatprep.subr.mxu1 %v724_v57  ;;  %919 = vmatprep.subr.mxu0 %v1921_v62  ;;  %v1045_v17 = vpop.permute.xlu0 %1044 }
 0x3ae   :  { %v713_v4 = vsel %vm358_vm7, %v710_v45, %v712_v61  ;;  %v714_v9 = vsel %vm358_vm7, %v712_v61, %v710_v45  ;;  %757 = vmatpush1.msra.mxu1 %v723_v54  ;;  %920 = vmatpush1.msra.mxu0 %v1937_v8  ;;  %v867_v8 = vsel %vm126_vm0, %v1975_v6, %v1977_v7  ;;  %v2088_v6 = vld [vmem:[#allocation7 + $0x10] sm:$0xff] }
 0x3af   :  { %v715_v11 = vmul.f32 %v713_v4, %v1878_v0  ;;  %v716_v62 = vmul.f32 %v714_v9, %v1881_v1  ;;  %921 = vmatprep.subr.mxu0 %v878_v59  ;;  %v868_v7 = vmul.f32 %v867_v8, %v1791_v16  ;;  %v850_v45 = vsel %vm86_vm6, %v1989_v35, %v1987_v34 }
 0x3b0   :  { %922 = vmatpush1.msra.mxu0 %v877_v29  ;;  %v853_v52 = vmul.f32 %v850_v45, %v1865_v56 }
 0x3b1   :  { %v704_v12 = vpop.permute.xlu1 %703  ;;  %758 = vmatprep.subr.mxu1 %v716_v62  ;;  %1090 = vmatprep.subr.mxu0 %v1059_v10  ;;  %v1037_v50 = vpop.permute.xlu0 %1036 }
 0x3b2   :  { %v705_v22 = vsel %vm338_vm8, %v702_v60, %v704_v12  ;;  %v706_v24 = vsel %vm338_vm8, %v704_v12, %v702_v60  ;;  %759 = vmatpush1.msra.mxu1 %v715_v11  ;;  %1538 = vmatmul.mubr.msk.f32.vlgmr.msra.gmra.mxu0 %vm185_vm4, %v1833_v39  ;;  %v859_v39 = vsel %vm106_vm3, %v1979_v30, %v1981_v31 }
 0x3b3   :  { %v707_v40 = vmul.f32 %v705_v22, %v1898_v18  ;;  %v708_v41 = vmul.f32 %v706_v24, %v1901_v21  ;;  %1091 = vmatpush1.msra.mxu0 %v1058_v33  ;;  %1128 = vmatprep.mubr.f32.mxu0 %v1673_v2  ;;  %v851_v30 = vsel %vm86_vm6, %v1987_v34, %v1989_v35 }
 0x3b4   :  { %v860_v51 = vmul.f32 %v859_v39, %v1824_v36  ;;  %v852_v34 = vmul.f32 %v851_v30, %v1862_v55 }
 0x3b5   :  { %v1047_v43 = vpop.permute.xlu1 %1046  ;;  %760 = vmatprep.subr.mxu1 %v708_v41 }
 0x3b6   :  { %v1048_v25 = vsel %vm358_vm7, %v1045_v17, %v1047_v43  ;;  %v1049_v26 = vsel %vm358_vm7, %v1047_v43, %v1045_v17  ;;  %761 = vmatpush1.msra.mxu1 %v707_v40 }
 0x3b7   :  { %v1050_v31 = vmul.f32 %v1048_v25, %v1878_v0  ;;  %v1051_v49 = vmul.f32 %v1049_v26, %v1881_v1  ;;  %1537 = vmatmul.mubr.msk.f32.vlgmr.msra.gmra.mxu1 %vm185_vm4, %v2088_v6  ;;  %991 = vmatprep.subr.mxu1 %v869_v42 }
 0x3b8   :  { %992 = vmatpush1.msra.mxu1 %v868_v7  ;;  %1029 = vmatprep.mubr.f32.mxu1 %v1673_v2 }
 0x3b9   :  { %v1039_v53 = vpop.permute.xlu1 %1038  ;;  %993 = vmatprep.subr.mxu1 %v861_v44  ;;  %1092 = vmatprep.subr.mxu0 %v1051_v49 }
 0x3ba   :  { %v1040_v35 = vsel %vm338_vm8, %v1037_v50, %v1039_v53  ;;  %v1041_v54 = vsel %vm338_vm8, %v1039_v53, %v1037_v50  ;;  %994 = vmatpush1.msra.mxu1 %v860_v51  ;;  %1093 = vmatpush1.msra.mxu0 %v1050_v31 }
 0x3bb   :  { %v1042_v57 = vmul.f32 %v1040_v35, %v1898_v18  ;;  %v1043_v28 = vmul.f32 %v1041_v54, %v1901_v21  ;;  %995 = vmatprep.subr.mxu1 %v853_v52 }
 0x3bc   :  { %996 = vmatpush1.msra.mxu1 %v852_v34 }
 0x3bd   :  { %1539 = vmatmul.mubr.msk.f32.vlgmr.msra.gmra.mxu1 %vm185_vm4, %v1883_v3  ;;  %1094 = vmatprep.subr.mxu0 %v1043_v28 }
 0x3be   :  { %1095 = vmatpush1.msra.mxu0 %v1042_v57  ;;  %1284 = vmatprep.mubr.f32.mxu1 %v1673_v2 }
 0x3bf   :  { %1540 = vmatmul.mubr.msk.f32.vlgmr.msra.gmra.mxu0 %vm185_vm4, %v1910_v27 }
 0x3c0   :  { %1358 = vmatprep.mubr.f32.mxu0 %v1673_v2 }
 0x467   :  { %v622_v29 = vpop.f32.mrf.mxu1 }
 0x469   :  { %v624_v60 = vpop.f32.mrf.mxu1 }
 0x46b   :  { %v696_v59 = vpop.f32.mrf.mxu0 }
 0x46c   :  { %v697_v61 = vadd.f32 %v696_v59, %v622_v29 }
 0x46d   :  { %v698_v63 = vpop.f32.mrf.mxu0 }
 0x46e   :  { %v699_v4 = vadd.f32 %v698_v63, %v624_v60 }
 0x472   :  { %v957_v11 = vpop.f32.mrf.mxu0 }
 0x474   :  { %v959_v32 = vpop.f32.mrf.mxu0 }
 0x477   :  { %v796_v9 = vpop.f32.mrf.mxu1 }
 0x478   :  { %v2129_v10 = vadd.f32 %v796_v9, %v697_v61 }
 0x479   :  { %v798_v3 = vpop.f32.mrf.mxu1 }
 0x47a   :  { %v2131_v62 = vadd.f32 %v798_v3, %v699_v4 }
 0x47c   :  { %v803_v61 = vadd.f32 %v2131_v62, %v2129_v10 }
 0x47d   :  { %v1031_v33 = vpop.f32.mrf.mxu1 }
 0x47e   :  { %v1032_v12 = vadd.f32 %v1031_v33, %v957_v11 }
 0x47f   :  { %v1033_v17 = vpop.f32.mrf.mxu1  ;;  %v1130_v27 = vpop.f32.mrf.mxu0 }
 0x480   :  { %v1034_v8 = vadd.f32 %v1033_v17, %v959_v32  ;;  %v1135_v22 = vadd.f32 %v1130_v27, %v1032_v12 }
 0x481   :  { %v1132_v24 = vpop.f32.mrf.mxu0 }
 0x482   :  { %v1136_v38 = vadd.f32 %v1132_v24, %v1034_v8  ;;  %v1140_v41 = vmul.f32 %v1135_v22, %v1135_v22 }
 0x484   :  { %v1137_v40 = vadd.f32 %v1136_v38, %v1135_v22  ;;  %v1141_v7 = vmul.f32 %v1136_v38, %v1136_v38 }
 0x486   :  { %1138 = vadd.xlane.f32.xlu0 %v1137_v40  ;;  %v1142_v42 = vadd.f32 %v1141_v7, %v1140_v41 }
 0x488   :  { %1143 = vadd.xlane.f32.xlu1 %v1142_v42 }
 0x50f   :  { %v1139_v39 = vpop.xlane.xlu0 %1138 }
 0x510   :  { %v1145_v43 = vmul.f32 0.00390625, %v1139_v39 }
 0x511   :  { %v1144_v44 = vpop.xlane.xlu1 %1143 }
 0x512   :  { %v1147_v45 = vmul.f32 %v1145_v43, %v1145_v43  ;;  %v1146_v25 = vmul.f32 0.00390625, %v1144_v44 }
 0x514   :  { %v1148_v26 = vsub.f32 %v1146_v25, %v1147_v45 }
 0x516   :  { %v1149_v30 = vmax.f32 %v1148_v26, 0.0 }
 0x518   :  { %v1150_v31 = vadd.f32 1e-05, %v1149_v30 }
 0x51a   :  { %1572 = vrsqrt.f32 %v1150_v31 }
 0x527   :  { %v1573_v49 = vpop.eup %1572 }
 0x528   :  { %v1152_v50 = vmul.f32 %v1573_v49, %v1918_v58 }
 0x52a   :  { %1161 = vperm.xlu1 %1564, %v1152_v50   ;;  %v1153_v51 = vmul.f32 %v1152_v50, %v1145_v43 }
 0x52c   :  { %1155 = vrot.lane.b32.xlu0 %v1153_v51, %s1674_s2 }
 0x59e   :  { %v1156_v52 = vpop.permute.xlu0 %1155 }
 0x59f   :  { %v1158_v53 = vsub.f32 %v1918_v58, %v1156_v52 }
 0x5a1   :  { %1168 = vperm.xlu0 %1565, %v1158_v53  }
 0x5a5   :  { %v1162_v34 = vpop.permute.xlu1 %1161 }
 0x5a6   :  { %v1164_v35 = vmul.f32 %v1162_v34, %v1135_v22  ;;  %v1165_v54 = vmul.f32 %v1162_v34, %v1136_v38 }
 0x61c   :  { %v1169_v57 = vpop.permute.xlu0 %1168 }
 0x61d   :  { %v1171_v28 = vadd.f32 %v1169_v57, %v1164_v35  ;;  %v1172_v29 = vadd.f32 %v1169_v57, %v1165_v54 }
 0x61f   :  { %v1173_v59 = vmax.f32 %v1171_v28, 0.0  ;;  %v1174_v60 = vmax.f32 %v1172_v29, 0.0 }
 0x621   :  { %1210 = vrot.lane.b32.xlu0 %v1174_v60, %s1672_s11  ;;  %1208 = vrot.lane.b32.xlu1 %v1173_v59, %s1672_s11 }
 0x625   :  { %1193 = vrot.lane.b32.xlu0 %v1174_v60, %s1671_s0  ;;  %1191 = vrot.lane.b32.xlu1 %v1173_v59, %s1671_s0 }
 0x629   :  { %1202 = vrot.lane.b32.xlu0 %v1174_v60, %s1674_s2  ;;  %1200 = vrot.lane.b32.xlu1 %v1173_v59, %s1674_s2 }
 0x62d   :  { %1185 = vrot.lane.b32.xlu0 %v1174_v60, %s1669_s29  ;;  %1183 = vrot.lane.b32.xlu1 %v1173_v59, %s1669_s29 }
 0x631   :  { %1383 = vrot.lane.b32.xlu0 %v1174_v60, %s1675_s12  ;;  %1381 = vrot.lane.b32.xlu1 %v1173_v59, %s1675_s12 }
 0x635   :  { %1177 = vrot.lane.b32.xlu0 %v1174_v60, %s1676_s13  ;;  %1175 = vrot.lane.b32.xlu1 %v1173_v59, %s1676_s13 }
 0x639   :  { %1375 = vrot.lane.b32.xlu0 %v1174_v60, %s1677_s14  ;;  %1373 = vrot.lane.b32.xlu1 %v1173_v59, %s1677_s14 }
 0x63d   :  { %1367 = vrot.lane.b32.xlu0 %v1174_v60, %s1678_s15  ;;  %1365 = vrot.lane.b32.xlu1 %v1173_v59, %s1678_s15 }
 0x661   :  { %804 = vadd.xlane.f32.xlu1 %v803_v61 }
 0x693   :  { %v1211_v63 = vpop.permute.xlu0 %1210  ;;  %v1209_v4 = vpop.permute.xlu1 %1208 }
 0x694   :  { %v1212_v9 = vsel %vm167_vm1, %v1209_v4, %v1211_v63  ;;  %v1213_v11 = vsel %vm167_vm1, %v1211_v63, %v1209_v4 }
 0x695   :  { %v1214_v3 = vmul.f32 %v1212_v9, %v1788_v15  ;;  %v1215_v32 = vmul.f32 %v1213_v11, %v1782_v13 }
 0x697   :  { %v1194_v33 = vpop.permute.xlu0 %1193  ;;  %1246 = vmatprep.subr.mxu1 %v1215_v32  ;;  %v1192_v12 = vpop.permute.xlu1 %1191 }
 0x698   :  { %v1195_v17 = vsel %vm126_vm0, %v1192_v12, %v1194_v33  ;;  %v1196_v27 = vsel %vm126_vm0, %v1194_v33, %v1192_v12  ;;  %1247 = vmatpush1.msra.mxu1 %v1214_v3  ;;  %v1681_v3 = vmov 2  }
 0x699   :  { %v1197_v8 = vmul.f32 %v1196_v27, %v1791_v16  ;;  %v1198_v22 = vmul.f32 %v1195_v17, %v1785_v14  ;;  %1248 = vmatprep.subr.mxu1 %v1174_v60  ;;  %1566 = vset.pattern.permute.xlu1 %v1681_v3 }
 0x69a   :  { %1249 = vmatpush1.msra.mxu1 %v1173_v59  ;;  %1567 = vset.pattern.permute.xlu0 %v1681_v3 }
 0x69b   :  { %v1203_v24 = vpop.permute.xlu0 %1202  ;;  %1320 = vmatprep.subr.mxu0 %v1198_v22  ;;  %v1201_v15 = vpop.permute.xlu1 %1200 }
 0x69c   :  { %v1204_v13 = vsel %vm147_vm2, %v1201_v15, %v1203_v24  ;;  %v1205_v38 = vsel %vm147_vm2, %v1203_v24, %v1201_v15  ;;  %1321 = vmatpush1.msra.mxu0 %v1197_v8 }
 0x69d   :  { %v1206_v40 = vmul.f32 %v1205_v38, %v1795_v19  ;;  %v1207_v41 = vmul.f32 %v1204_v13, %v1798_v20 }
 0x69f   :  { %v1186_v7 = vpop.permute.xlu0 %1185  ;;  %1250 = vmatprep.subr.mxu1 %v1207_v41  ;;  %v1184_v16 = vpop.permute.xlu1 %1183 }
 0x6a0   :  { %v1187_v14 = vsel %vm106_vm3, %v1184_v16, %v1186_v7  ;;  %v1188_v42 = vsel %vm106_vm3, %v1186_v7, %v1184_v16  ;;  %1251 = vmatpush1.msra.mxu1 %v1206_v40 }
 0x6a1   :  { %v1189_v39 = vmul.f32 %v1188_v42, %v1824_v36  ;;  %v1190_v43 = vmul.f32 %v1187_v14, %v1827_v37  ;;  %1541 = vmatmul.mubr.msk.f32.vlgmr.msra.gmra.mxu1 %vm185_vm4, %v2015_v23 }
 0x6a2   :  { %1457 = vmatprep.mubr.f32.mxu1 %v1673_v2 }
 0x6a3   :  { %v1384_v19 = vpop.permute.xlu0 %1383  ;;  %1322 = vmatprep.subr.mxu0 %v1190_v43  ;;  %v1382_v20 = vpop.permute.xlu1 %1381 }
 0x6a4   :  { %v1385_v44 = vsel %vm378_vm5, %v1382_v20, %v1384_v19  ;;  %v1386_v45 = vsel %vm378_vm5, %v1384_v19, %v1382_v20  ;;  %1323 = vmatpush1.msra.mxu0 %v1189_v39 }
 0x6a5   :  { %v1387_v25 = vmul.f32 %v1385_v44, %v1843_v46  ;;  %v1388_v36 = vmul.f32 %v1386_v45, %v1846_v47  ;;  %v1682_v45 = vmov 3  }
 0x6a7   :  { %v1178_v37 = vpop.permute.xlu0 %1177  ;;  %1419 = vmatprep.subr.mxu1 %v1388_v36  ;;  %v1176_v26 = vpop.permute.xlu1 %1175 }
 0x6a8   :  { %v1179_v2 = vsel %vm86_vm6, %v1176_v26, %v1178_v37  ;;  %v1180_v23 = vsel %vm86_vm6, %v1178_v37, %v1176_v26  ;;  %1420 = vmatpush1.msra.mxu1 %v1387_v25 }
 0x6a9   :  { %v1181_v30 = vmul.f32 %v1180_v23, %v1862_v55  ;;  %v1182_v31 = vmul.f32 %v1179_v2, %v1865_v56 }
 0x6ab   :  { %v1376_v49 = vpop.permute.xlu0 %1375  ;;  %1324 = vmatprep.subr.mxu0 %v1182_v31  ;;  %v1374_v50 = vpop.permute.xlu1 %1373 }
 0x6ac   :  { %v1377_v46 = vsel %vm358_vm7, %v1374_v50, %v1376_v49  ;;  %v1378_v47 = vsel %vm358_vm7, %v1376_v49, %v1374_v50  ;;  %1325 = vmatpush1.msra.mxu0 %v1181_v30 }
 0x6ad   :  { %v1379_v51 = vmul.f32 %v1377_v46, %v1878_v0  ;;  %v1380_v52 = vmul.f32 %v1378_v47, %v1881_v1  ;;  %1542 = vmatmul.mubr.msk.f32.vlgmr.msra.gmra.mxu0 %vm185_vm4, %v2029_v48 }
 0x6af   :  { %v1368_v55 = vpop.permute.xlu0 %1367  ;;  %1421 = vmatprep.subr.mxu1 %v1380_v52  ;;  %v1366_v56 = vpop.permute.xlu1 %1365 }
 0x6b0   :  { %v1369_v53 = vsel %vm338_vm8, %v1366_v56, %v1368_v55  ;;  %v1370_v34 = vsel %vm338_vm8, %v1368_v55, %v1366_v56  ;;  %1422 = vmatpush1.msra.mxu1 %v1379_v51 }
 0x6b1   :  { %v1371_v35 = vmul.f32 %v1369_v53, %v1898_v18  ;;  %v1372_v54 = vmul.f32 %v1370_v34, %v1901_v21  ;;  %v807_v21 = vmul.f32 %v2131_v62, %v2131_v62 }
 0x6b3   :  { %1423 = vmatprep.subr.mxu1 %v1372_v54 }
 0x6b4   :  { %1424 = vmatpush1.msra.mxu1 %v1371_v35 }
 0x6b5   :  { %1543 = vmatmul.mubr.msk.f32.vlgmr.msra.gmra.mxu1 %vm185_vm4, %v2088_v6  ;;  %v806_v6 = vmul.f32 %v2129_v10, %v2129_v10 }
 0x6b7   :  { %v808_v11 = vadd.f32 %v807_v21, %v806_v6 }
 0x6ea   :  { %v805_v32 = vpop.xlane.xlu1 %804 }
 0x6eb   :  { %v811_v12 = vmul.f32 0.00390625, %v805_v32 }
 0x6ed   :  { %v813_v15 = vmul.f32 %v811_v12, %v811_v12 }
 0x761   :  { %v1286_v0 = vpop.f32.mrf.mxu1 }
 0x763   :  { %v1288_v48 = vpop.f32.mrf.mxu1 }
 0x76d   :  { %v1360_v1 = vpop.f32.mrf.mxu0 }
 0x76e   :  { %v1361_v28 = vadd.f32 %v1360_v1, %v1286_v0 }
 0x76f   :  { %v1362_v57 = vpop.f32.mrf.mxu0 }
 0x770   :  { %v1363_v59 = vadd.f32 %v1362_v57, %v1288_v48 }
 0x775   :  { %v1459_v29 = vpop.f32.mrf.mxu1 }
 0x776   :  { %v1464_v60 = vadd.f32 %v1459_v29, %v1361_v28 }
 0x777   :  { %v1461_v5 = vpop.f32.mrf.mxu1 }
 0x778   :  { %v1465_v61 = vadd.f32 %v1461_v5, %v1363_v59  ;;  %v1469_v4 = vmul.f32 %v1464_v60, %v1464_v60 }
 0x77a   :  { %v1466_v63 = vadd.f32 %v1465_v61, %v1464_v60  ;;  %v1470_v18 = vmul.f32 %v1465_v61, %v1465_v61 }
 0x77c   :  { %1467 = vadd.xlane.f32.xlu0 %v1466_v63  ;;  %v1471_v9 = vadd.f32 %v1470_v18, %v1469_v4 }
 0x77e   :  { %1472 = vadd.xlane.f32.xlu1 %v1471_v9 }
 0x780   :  { %809 = vadd.xlane.f32.xlu0 %v808_v11 }
 0x805   :  { %v1468_v33 = vpop.xlane.xlu0 %1467 }
 0x806   :  { %v1474_v17 = vmul.f32 0.00390625, %v1468_v33 }
 0x807   :  { %v1473_v27 = vpop.xlane.xlu1 %1472 }
 0x808   :  { %v1476_v8 = vmul.f32 %v1474_v17, %v1474_v17  ;;  %v1475_v22 = vmul.f32 0.00390625, %v1473_v27 }
 0x809   :  { %v810_v24 = vpop.xlane.xlu0 %809 }
 0x80a   :  { %v1477_v13 = vsub.f32 %v1475_v22, %v1476_v8  ;;  %v812_v38 = vmul.f32 0.00390625, %v810_v24 }
 0x80c   :  { %v1478_v40 = vmax.f32 %v1477_v13, 0.0  ;;  %v814_v41 = vsub.f32 %v812_v38, %v813_v15 }
 0x80e   :  { %v1479_v7 = vadd.f32 1e-05, %v1478_v40  ;;  %v815_v16 = vmax.f32 %v814_v41, 0.0 }
 0x810   :  { %1574 = vrsqrt.f32 %v1479_v7  ;;  %v816_v14 = vadd.f32 1e-05, %v815_v16 }
 0x812   :  { %1576 = vrsqrt.f32 %v816_v14 }
 0x81d   :  { %v1575_v42 = vpop.eup %1574 }
 0x81e   :  { %v1481_v39 = vmul.f32 %v1575_v42, %v1918_v58 }
 0x81f   :  { %v1577_v43 = vpop.eup %1576 }
 0x820   :  { %v1482_v19 = vmul.f32 %v1481_v39, %v1474_v17  ;;  %v818_v20 = vmul.f32 %v1577_v43, %v1918_v58 }
 0x822   :  { %1484 = vrot.lane.b32.xlu1 %v1482_v19, %s1674_s2  ;;  %v819_v44 = vmul.f32 %v818_v20, %v811_v12 }
 0x824   :  { %821 = vrot.lane.b32.xlu0 %v819_v44, %s1674_s2 }
 0x826   :  { %827 = vperm.xlu1 %1566, %v818_v20  }
 0x828   :  { %1490 = vperm.xlu0 %1567, %v1481_v39  }
 0x82a   :  { %1568 = vset.pattern.permute.xlu1 %v1682_v45 }
 0x82c   :  { %1569 = vset.pattern.permute.xlu0 %v1682_v45 }
 0x894   :  { %v1485_v37 = vpop.permute.xlu1 %1484 }
 0x895   :  { %v1487_v26 = vsub.f32 %v1918_v58, %v1485_v37 }
 0x896   :  { %v822_v25 = vpop.permute.xlu0 %821 }
 0x897   :  { %v824_v36 = vsub.f32 %v1918_v58, %v822_v25 }
 0x899   :  { %834 = vperm.xlu1 %1568, %v824_v36  }
 0x89d   :  { %1497 = vperm.xlu1 %1568, %v1487_v26  }
 0x8a1   :  { %v828_v2 = vpop.permute.xlu1 %827 }
 0x8a2   :  { %v830_v23 = vmul.f32 %v828_v2, %v2129_v10  ;;  %v831_v30 = vmul.f32 %v828_v2, %v2131_v62 }
 0x8a3   :  { %v1491_v31 = vpop.permute.xlu0 %1490 }
 0x8a4   :  { %v1493_v47 = vmul.f32 %v1491_v31, %v1464_v60  ;;  %v1494_v51 = vmul.f32 %v1491_v31, %v1465_v61 }
 0x914   :  { %v835_v49 = vpop.permute.xlu1 %834 }
 0x915   :  { %v837_v50 = vadd.f32 %v835_v49, %v830_v23  ;;  %v838_v46 = vadd.f32 %v835_v49, %v831_v30 }
 0x917   :  { %v839_v52 = vmax.f32 %v837_v50, 0.0  ;;  %v840_v55 = vmax.f32 %v838_v46, 0.0 }
 0x918   :  { %v1498_v56 = vpop.permute.xlu1 %1497 }
 0x919   :  { %841 = vst [vmem:[#allocation8] sm:$0xff] %v839_v52  ;;  %842 = vst [vmem:[#allocation8 + $0x8] sm:$0xff] %v840_v55  ;;  %v1500_v58 = vadd.f32 %v1498_v56, %v1493_v47  ;;  %v1501_v53 = vadd.f32 %v1498_v56, %v1494_v51 }
 0x91b   :  { %v1502_v34 = vmax.f32 %v1500_v58, 0.0  ;;  %v1503_v35 = vmax.f32 %v1501_v53, 0.0 }
 0x91d   :  { %1505 = vst [vmem:[#allocation8 + $0x10] sm:$0xff] %v1502_v34  ;;  %1506 = vst [vmem:[#allocation8 + $0x18] sm:$0xff] %v1503_v35 }
 0x91e   :  { %1649 = shalt.err (!%p1646_p5)
}
 0x91f   :  { %1518 = dma.vmem_to_hbm [thread:$0]  %s1513_s9, 512, %s2232_s5, [#allocation4], %s1668_s28, %s1668_s28, %s1669_s29  }
 0x920   :  { %1662 = dma.done.wait [#allocation4], 512  }
 0x921   :  { %1663 = vsyncadd [#allocation4], 4294966784 }
 0x922   :  { %1522 = vsyncpa [#allocation3], 1 }
 0x923   :  { %1523 = vsyncpa [#allocation6], 1 }
 0x924   :  { %1524 = vsyncpa [#allocation4], 1 }

</bundles_post_ra>
